<compile_context>
chip_gen: v5e
topology: v5e:2x2
jax: 0.10.0
libtpu: 0.0.40
codegen_flags: <defaults>
</compile_context>

<pallas_src>
import functools

import jax
import jax.numpy as jnp
from jax.experimental import pallas as pl
from jax.experimental.pallas import tpu as pltpu

VMEM_SPEC = pl.BlockSpec(memory_space=pltpu.MemorySpace.VMEM)

EMBED = 64


# ----------------------------------------------------------------------------
# Fused Pallas kernel: whole SpGAT forward in one invocation.
# ----------------------------------------------------------------------------
def _spgat_fused_kernel(
    # data
    x_ref,
    # u->v multi-head (input linear folded into w/b host-side)
    w_uv_ref, b_uv_ref, adst_uv_ref, asrc_uv_ref, aef_uv_ref,
    # u->v output attention (single head)
    wo_uv_ref, aod_uv_ref, aos_uv_ref, aoe_uv_ref,
    # v->u multi-head (packed)
    w_vu_ref, adst_vu_ref, asrc_vu_ref, aef_vu_ref,
    # v->u output attention (single head)
    wo_vu_ref, aod_vu_ref, aos_vu_ref, aoe_vu_ref,
    # output MLP
    w1_ref, b1_ref, w2_ref, b2_ref, w3_ref,
    # edges
    ea0_ref, ea1_ref, eb0_ref, eb1_ref, ef_ref,
    # outputs
    out_x_ref, out_edge_ref,
    *, alpha, nheads, nhid, reuse_reversed):

    f32 = jnp.float32
    bf16 = jnp.bfloat16
    N = x_ref.shape[0]
    E = ef_ref.shape[0]
    HD = nheads * nhid

    # One broadcasted iota, reused for every one-hot build (no CSE of
    # broadcast_in_dim; the compare/select build is pure VPU work on v5e).
    iota_en = jax.lax.broadcasted_iota(jnp.int32, (E, N), 1)

    def onehot(idx):
        # bf16 one-hot: 0/1 exact, halves O(E*N) VMEM, bf16-native MXU path.
        return (iota_en == idx).astype(bf16)

    sel_dst_a = onehot(ea0_ref[...])
    sel_src_a = onehot(ea1_ref[...])
    if reuse_reversed:
        # edgeB is edgeA with the two rows swapped -> reuse the sel matrices.
        sel_dst_b, sel_src_b = sel_src_a, sel_dst_a
    else:
        sel_dst_b = onehot(eb0_ref[...])
        sel_src_b = onehot(eb1_ref[...])

    # Head-expansion matrix: expand_h[h, c] = 1 iff column c belongs to head h.
    col = jax.lax.broadcasted_iota(jnp.int32, (nheads, HD), 1)
    row = jax.lax.broadcasted_iota(jnp.int32, (nheads, HD), 0)
    expand_h = jnp.logical_and(col >= row * nhid, col < (row + 1) * nhid).astype(f32)

    dn_t = (((0,), (0,)), ((), ()))   # contract edge axis: sel^T @ v

    def attn(h_in, w, bias, a_dst, a_src, a_ef, ef, sel_dst, sel_src,
             expand, apply_elu):
        # h_in: (N, Din); w: (Din, F); a_dst/a_src: (F, H); a_ef: (1, H)
        h = jnp.dot(h_in, w, preferred_element_type=f32)               # (N, F)
        if bias is not None:
            h = h + bias
        h_bf = h.astype(bf16)

        # Gather source-node embeddings per edge (bf16 one-hot gather).
        h_src = jnp.dot(sel_src, h_bf, preferred_element_type=f32)     # (E, F)

        # dst score per node, gathered to edges; src score straight from the
        # already-gathered h_src (saves one full (E,N) MXU pass per call).
        s_dst = jnp.dot(h, a_dst, preferred_element_type=f32)          # (N, H)
        s_dst_e = jnp.dot(sel_dst, s_dst.astype(bf16),
                          preferred_element_type=f32)                  # (E, H)
        s_src_e = jnp.dot(h_src, a_src, preferred_element_type=f32)    # (E, H)

        # K=1 edge-feature term stays on the VPU (broadcast multiply).
        z = s_dst_e + s_src_e + ef * a_ef                              # (E, H)
        lrelu = jnp.where(z > 0, z, alpha * z)
        edge_e = jnp.exp(-lrelu)                                       # (E, H)

        if expand is None:                                             # single head
            e_exp = edge_e                                             # (E, 1)
        else:                                                          # multi head
            e_exp = jnp.dot(edge_e, expand, preferred_element_type=f32)  # (E, F)
        weighted = e_exp * h_src                                       # (E, F)

        # ONE fused scatter over sel_dst: sel_dst^T @ [weighted | e].
        packed = jnp.concatenate([weighted, e_exp], axis=1)            # (E, F+C)
        packed_agg = jax.lax.dot_general(sel_dst, packed.astype(bf16), dn_t,
                                         preferred_element_type=f32)   # (N, F+C)
        F = weighted.shape[1]
        agg = packed_agg[:, :F]
        rowsum = packed_agg[:, F:]

        # Zero-degree guard (reference would divide by ~0) — documented change.
        rowsum = jnp.where(rowsum > 0, rowsum, 1.0)
        h_prime = agg * pl.reciprocal(rowsum, approx=True)
        if apply_elu:
            h_prime = jnp.where(h_prime > 0, h_prime,
                                jnp.exp(jnp.minimum(h_prime, 0.0)) - 1.0)
        return h_prime, edge_e

    ef0 = ef_ref[...]                                                  # (E, 1)

    # ---- u -> v: multi-head (concat=True), then output attention ------------
    x_heads, edge_uv = attn(x_ref[...], w_uv_ref[...], b_uv_ref[...],
                            adst_uv_ref[...], asrc_uv_ref[...], aef_uv_ref[...],
                            ef0, sel_dst_a, sel_src_a,
                            expand_h, apply_elu=True)                  # (N,HD),(E,H)
    x_uv, _ = attn(x_heads, wo_uv_ref[...], None,
                   aod_uv_ref[...], aos_uv_ref[...], aoe_uv_ref[...],
                   ef0, sel_dst_a, sel_src_a,
                   None, apply_elu=False)                              # (N, 64)
    new_edge = jnp.mean(edge_uv, axis=1, keepdims=True)                # (E, 1)

    # ---- v -> u: multi-head (concat=True), then output attention ------------
    x_heads2, edge_vu = attn(x_uv, w_vu_ref[...], None,
                             adst_vu_ref[...], asrc_vu_ref[...], aef_vu_ref[...],
                             new_edge, sel_dst_b, sel_src_b,
                             expand_h, apply_elu=True)
    x_vu, _ = attn(x_heads2, wo_vu_ref[...], None,
                   aod_vu_ref[...], aos_vu_ref[...], aoe_vu_ref[...],
                   new_edge, sel_dst_b, sel_src_b,
                   None, apply_elu=False)                              # (N, 64)
    new_edge_ = jnp.mean(edge_vu, axis=1, keepdims=True)               # (E, 1)

    # ---- output MLP + sigmoid ------------------------------------------------
    h1 = jnp.maximum(jnp.dot(x_vu, w1_ref[...],
                             preferred_element_type=f32) + b1_ref[...], 0.0)
    h2 = jnp.maximum(jnp.dot(h1, w2_ref[...],
                             preferred_element_type=f32) + b2_ref[...], 0.0)
    logits = jnp.dot(h2, w3_ref[...], preferred_element_type=f32)      # (N, 1)

    out_x_ref[...] = 1.0 / (1.0 + jnp.exp(-logits))
    out_edge_ref[...] = new_edge_


# ----------------------------------------------------------------------------
# Parameter construction (deterministic, synthetic) + packing for the kernel.
# ----------------------------------------------------------------------------
def init_params(key, nfeat, nhid, nheads):
    def nxt():
        nonlocal key
        key, sub = jax.random.split(key)
        return sub

    def xavier(shape, gain=1.414):
        fan_in, fan_out = shape[-2], shape[-1]
        std = gain * (2.0 / (fan_in + fan_out)) ** 0.5
        return std * jax.random.normal(nxt(), shape, jnp.float32)

    def head_params(din, dout):
        return [(xavier((din, dout)), xavier((1, 2 * dout + 1)))
                for _ in range(nheads)]

    def pack_heads(heads, dout):
        # Stack per-head W column-wise; build block matrices for the a-vectors.
        w_all = jnp.concatenate([w for (w, _) in heads], axis=1)      # (din, H*dout)
        a_all = jnp.concatenate([a for (_, a) in heads], axis=0)      # (H, 2*dout+1)
        hd = nheads * dout
        adst = jnp.zeros((hd, nheads), jnp.float32)
        asrc = jnp.zeros((hd, nheads), jnp.float32)
        for h in range(nheads):
            adst = adst.at[h * dout:(h + 1) * dout, h].set(a_all[h, :dout])
            asrc = asrc.at[h * dout:(h + 1) * dout, h].set(a_all[h, dout:2 * dout])
        aef = a_all[:, 2 * dout:2 * dout + 1].T                       # (1, H)
        return w_all, adst, asrc, aef

    def pack_single(a, d):
        return a[:, :d].T, a[:, d:2 * d].T, a[:, 2 * d:2 * d + 1]     # (d,1),(d,1),(1,1)

    p = {}
    p["W_in"] = xavier((nfeat, EMBED), gain=1.0)
    p["b_in"] = 0.01 * jax.random.normal(nxt(), (1, EMBED), jnp.float32)

    p["W_uv"], p["Adst_uv"], p["Asrc_uv"], p["aef_uv"] = pack_heads(
        head_params(EMBED, nhid), nhid)
    p["W_vu"], p["Adst_vu"], p["Asrc_vu"], p["aef_vu"] = pack_heads(
        head_params(EMBED, nhid), nhid)

    p["W_out_uv"] = xavier((nhid * nheads, EMBED))
    p["aod_uv"], p["aos_uv"], p["aoe_uv"] = pack_single(xavier((1, 2 * EMBED + 1)), EMBED)
    p["W_out_vu"] = xavier((nhid * nheads, EMBED))
    p["aod_vu"], p["aos_vu"], p["aoe_vu"] = pack_single(xavier((1, 2 * EMBED + 1)), EMBED)

    p["W1"] = xavier((EMBED, EMBED), gain=1.0)
    p["b1"] = 0.01 * jax.random.normal(nxt(), (1, EMBED), jnp.float32)
    p["W2"] = xavier((EMBED, EMBED), gain=1.0)
    p["b2"] = 0.01 * jax.random.normal(nxt(), (1, EMBED), jnp.float32)
    p["W3"] = xavier((EMBED, 1), gain=1.0)   # final Linear has bias=False
    return p


# ----------------------------------------------------------------------------
# SpGAT forward: ONE pallas_call, whole working set resident in VMEM.
# ----------------------------------------------------------------------------
def spgat_forward(params, x, edgeA, edgeB, edge_feat, *, alpha, nheads, nhid):
    n = x.shape[0]
    e = edge_feat.shape[0]
    ea0 = edgeA[0].reshape(-1, 1).astype(jnp.int32)
    ea1 = edgeA[1].reshape(-1, 1).astype(jnp.int32)
    eb0 = edgeB[0].reshape(-1, 1).astype(jnp.int32)
    eb1 = edgeB[1].reshape(-1, 1).astype(jnp.int32)

    # Fold the input Linear into the first multi-head projection (one-time):
    # (x @ W_in + b_in) @ W_uv == x @ (W_in @ W_uv) + (b_in @ W_uv)
    w_uv = params["W_in"] @ params["W_uv"]      # (nfeat, H*nhid)
    b_uv = params["b_in"] @ params["W_uv"]      # (1, H*nhid)

    # Reuse the one-hot gather/scatter matrices when edgeB is edgeA reversed
    # (halves the O(E*N) one-hot build / VMEM; matters most on v7x / v5e).
    try:
        reuse_reversed = bool(jnp.array_equal(edgeB, edgeA[::-1]))
    except Exception:   # traced edges -> decide conservatively
        reuse_reversed = False

    args = (
        x,
        w_uv, b_uv, params["Adst_uv"], params["Asrc_uv"], params["aef_uv"],
        params["W_out_uv"], params["aod_uv"], params["aos_uv"], params["aoe_uv"],
        params["W_vu"], params["Adst_vu"], params["Asrc_vu"], params["aef_vu"],
        params["W_out_vu"], params["aod_vu"], params["aos_vu"], params["aoe_vu"],
        params["W1"], params["b1"], params["W2"], params["b2"], params["W3"],
        ea0, ea1, eb0, eb1, edge_feat,
    )
    kernel = functools.partial(_spgat_fused_kernel,
                               alpha=alpha, nheads=nheads, nhid=nhid,
                               reuse_reversed=reuse_reversed)
    out_x, out_edge = pl.pallas_call(
        kernel,
        out_shape=(jax.ShapeDtypeStruct((n, 1), jnp.float32),
                   jax.ShapeDtypeStruct((e, 1), jnp.float32)),
        in_specs=[VMEM_SPEC] * len(args),
        out_specs=(VMEM_SPEC, VMEM_SPEC),
        compiler_params=pltpu.CompilerParams(
            vmem_limit_bytes=32 * 1024 * 1024),
    )(*args)
    return out_x, out_edge


# ----------------------------------------------------------------------------
if __name__ == "__main__":
    N = 24          # nodes (variables + constraints)
    E = 48          # edges
    NFEAT = 6
    NHID = 8
    NHEADS = 2
    ALPHA = 0.2
    # dropout = 0.5 in the module; inference mode -> identity (no-op here)

    key = jax.random.PRNGKey(0)
    k_par, k_x, k_ef, k_e = jax.random.split(key, 4)

    params = init_params(k_par, NFEAT, NHID, NHEADS)

    x = jax.random.normal(k_x, (N, NFEAT), jnp.float32)
    edge_feat = jax.random.normal(k_ef, (E, 1), jnp.float32)

    # Edge list: a ring (guarantees every node appears as both endpoints,
    # so rowsums are strictly positive in both directions) + random extras.
    ring_src = jnp.arange(N, dtype=jnp.int32)
    ring_dst = (ring_src + 1) % N
    extra_src = jax.random.randint(jax.random.fold_in(k_e, 0), (E - N,), 0, N, jnp.int32)
    extra_dst = jax.random.randint(jax.random.fold_in(k_e, 1), (E - N,), 0, N, jnp.int32)
    edgeA = jnp.stack([jnp.concatenate([ring_dst, extra_dst]),
                       jnp.concatenate([ring_src, extra_src])], axis=0)   # (2, E)
    edgeB = edgeA[::-1]                                                   # reversed direction

    out_x, out_edge = spgat_forward(params, x, edgeA, edgeB, edge_feat,
                                    alpha=ALPHA, nheads=NHEADS, nhid=NHID)
    jax.block_until_ready((out_x, out_edge))

    assert out_x.shape == (N, 1) and out_edge.shape == (E, 1)
    assert not bool(jnp.any(jnp.isnan(out_x))) and not bool(jnp.any(jnp.isnan(out_edge)))
    print("KERNEL_OK")
</pallas_src>

<mosaic_0001>
module attributes {stable_mosaic.version = 11 : i64} {
  func.func @_spgat_fused_kernel(%arg0: memref<24x6xf32, #tpu.memory_space<vmem>>, %arg1: memref<6x16xf32, #tpu.memory_space<vmem>>, %arg2: memref<1x16xf32, #tpu.memory_space<vmem>>, %arg3: memref<16x2xf32, #tpu.memory_space<vmem>>, %arg4: memref<16x2xf32, #tpu.memory_space<vmem>>, %arg5: memref<1x2xf32, #tpu.memory_space<vmem>>, %arg6: memref<16x64xf32, #tpu.memory_space<vmem>>, %arg7: memref<64x1xf32, #tpu.memory_space<vmem>>, %arg8: memref<64x1xf32, #tpu.memory_space<vmem>>, %arg9: memref<1x1xf32, #tpu.memory_space<vmem>>, %arg10: memref<64x16xf32, #tpu.memory_space<vmem>>, %arg11: memref<16x2xf32, #tpu.memory_space<vmem>>, %arg12: memref<16x2xf32, #tpu.memory_space<vmem>>, %arg13: memref<1x2xf32, #tpu.memory_space<vmem>>, %arg14: memref<16x64xf32, #tpu.memory_space<vmem>>, %arg15: memref<64x1xf32, #tpu.memory_space<vmem>>, %arg16: memref<64x1xf32, #tpu.memory_space<vmem>>, %arg17: memref<1x1xf32, #tpu.memory_space<vmem>>, %arg18: memref<64x64xf32, #tpu.memory_space<vmem>>, %arg19: memref<1x64xf32, #tpu.memory_space<vmem>>, %arg20: memref<64x64xf32, #tpu.memory_space<vmem>>, %arg21: memref<1x64xf32, #tpu.memory_space<vmem>>, %arg22: memref<64x1xf32, #tpu.memory_space<vmem>>, %arg23: memref<48x1xi32, #tpu.memory_space<vmem>>, %arg24: memref<48x1xi32, #tpu.memory_space<vmem>>, %arg25: memref<48x1xi32, #tpu.memory_space<vmem>>, %arg26: memref<48x1xi32, #tpu.memory_space<vmem>>, %arg27: memref<48x1xf32, #tpu.memory_space<vmem>>, %arg28: memref<24x1xf32, #tpu.memory_space<vmem>>, %arg29: memref<48x1xf32, #tpu.memory_space<vmem>>) attributes {dimension_semantics = [], scalar_prefetch = 0 : i64, scratch_operands = 0 : i64, tpu.core_type = #tpu.core_type<tc>} {
    %0 = tpu.iota {dimensions = array<i32: 1>} : vector<48x24xi32>
    %c0 = arith.constant 0 : index
    %c0_0 = arith.constant 0 : index
    %1 = vector.load %arg23[%c0, %c0_0] : memref<48x1xi32, #tpu.memory_space<vmem>>, vector<48x1xi32>
    %2 = vector.broadcast %1 : vector<48x1xi32> to vector<48x24xi32>
    %3 = arith.cmpi eq, %0, %2 : vector<48x24xi32>
    %4 = arith.extui %3 : vector<48x24xi1> to vector<48x24xi32>
    %5 = arith.sitofp %4 : vector<48x24xi32> to vector<48x24xf32>
    %6 = arith.truncf %5 : vector<48x24xf32> to vector<48x24xbf16>
    %c0_1 = arith.constant 0 : index
    %c0_2 = arith.constant 0 : index
    %7 = vector.load %arg24[%c0_1, %c0_2] : memref<48x1xi32, #tpu.memory_space<vmem>>, vector<48x1xi32>
    %8 = vector.broadcast %7 : vector<48x1xi32> to vector<48x24xi32>
    %9 = arith.cmpi eq, %0, %8 : vector<48x24xi32>
    %10 = arith.extui %9 : vector<48x24xi1> to vector<48x24xi32>
    %11 = arith.sitofp %10 : vector<48x24xi32> to vector<48x24xf32>
    %12 = arith.truncf %11 : vector<48x24xf32> to vector<48x24xbf16>
    %13 = tpu.iota {dimensions = array<i32: 1>} : vector<2x16xi32>
    %14 = tpu.iota {dimensions = array<i32: 0>} : vector<2x16xi32>
    %c8_i32 = arith.constant 8 : i32
    %15 = vector.broadcast %c8_i32 : i32 to vector<2x16xi32>
    %16 = arith.muli %14, %15 : vector<2x16xi32>
    %17 = arith.cmpi sge, %13, %16 : vector<2x16xi32>
    %c1_i32 = arith.constant 1 : i32
    %18 = vector.broadcast %c1_i32 : i32 to vector<2x16xi32>
    %19 = arith.addi %14, %18 : vector<2x16xi32>
    %c8_i32_3 = arith.constant 8 : i32
    %20 = vector.broadcast %c8_i32_3 : i32 to vector<2x16xi32>
    %21 = arith.muli %19, %20 : vector<2x16xi32>
    %22 = arith.cmpi slt, %13, %21 : vector<2x16xi32>
    %23 = arith.andi %17, %22 : vector<2x16xi1>
    %24 = arith.extui %23 : vector<2x16xi1> to vector<2x16xi32>
    %25 = arith.sitofp %24 : vector<2x16xi32> to vector<2x16xf32>
    %c0_4 = arith.constant 0 : index
    %c0_5 = arith.constant 0 : index
    %26 = vector.load %arg27[%c0_4, %c0_5] : memref<48x1xf32, #tpu.memory_space<vmem>>, vector<48x1xf32>
    %c0_6 = arith.constant 0 : index
    %c0_7 = arith.constant 0 : index
    %27 = vector.load %arg0[%c0_6, %c0_7] : memref<24x6xf32, #tpu.memory_space<vmem>>, vector<24x6xf32>
    %c0_8 = arith.constant 0 : index
    %c0_9 = arith.constant 0 : index
    %28 = vector.load %arg1[%c0_8, %c0_9] : memref<6x16xf32, #tpu.memory_space<vmem>>, vector<6x16xf32>
    %c0_10 = arith.constant 0 : index
    %c0_11 = arith.constant 0 : index
    %29 = vector.load %arg2[%c0_10, %c0_11] : memref<1x16xf32, #tpu.memory_space<vmem>>, vector<1x16xf32>
    %c0_12 = arith.constant 0 : index
    %c0_13 = arith.constant 0 : index
    %30 = vector.load %arg3[%c0_12, %c0_13] : memref<16x2xf32, #tpu.memory_space<vmem>>, vector<16x2xf32>
    %c0_14 = arith.constant 0 : index
    %c0_15 = arith.constant 0 : index
    %31 = vector.load %arg4[%c0_14, %c0_15] : memref<16x2xf32, #tpu.memory_space<vmem>>, vector<16x2xf32>
    %c0_16 = arith.constant 0 : index
    %c0_17 = arith.constant 0 : index
    %32 = vector.load %arg5[%c0_16, %c0_17] : memref<1x2xf32, #tpu.memory_space<vmem>>, vector<1x2xf32>
    %cst = arith.constant dense<0.000000e+00> : vector<24x16xf32>
    %33 = tpu.matmul %27, %28, %cst {dimension_numbers = #tpu.dot_dimension_numbers<[1], [0], [0], [1], [0, 0, 1, 1], [], []>} : vector<24x6xf32>, vector<6x16xf32>, vector<24x16xf32> -> vector<24x16xf32>
    %34 = vector.broadcast %29 : vector<1x16xf32> to vector<24x16xf32>
    %35 = arith.addf %33, %34 : vector<24x16xf32>
    %36 = arith.truncf %35 : vector<24x16xf32> to vector<24x16xbf16>
    %cst_18 = arith.constant dense<0.000000e+00> : vector<48x16xf32>
    %37 = tpu.matmul %12, %36, %cst_18 {dimension_numbers = #tpu.dot_dimension_numbers<[1], [0], [0], [1], [0, 0, 1, 1], [], []>} : vector<48x24xbf16>, vector<24x16xbf16>, vector<48x16xf32> -> vector<48x16xf32>
    %cst_19 = arith.constant dense<0.000000e+00> : vector<24x2xf32>
    %38 = tpu.matmul %35, %30, %cst_19 {dimension_numbers = #tpu.dot_dimension_numbers<[1], [0], [0], [1], [0, 0, 1, 1], [], []>} : vector<24x16xf32>, vector<16x2xf32>, vector<24x2xf32> -> vector<24x2xf32>
    %39 = arith.truncf %38 : vector<24x2xf32> to vector<24x2xbf16>
    %cst_20 = arith.constant dense<0.000000e+00> : vector<48x2xf32>
    %40 = tpu.matmul %6, %39, %cst_20 {dimension_numbers = #tpu.dot_dimension_numbers<[1], [0], [0], [1], [0, 0, 1, 1], [], []>} : vector<48x24xbf16>, vector<24x2xbf16>, vector<48x2xf32> -> vector<48x2xf32>
    %cst_21 = arith.constant dense<0.000000e+00> : vector<48x2xf32>
    %41 = tpu.matmul %37, %31, %cst_21 {dimension_numbers = #tpu.dot_dimension_numbers<[1], [0], [0], [1], [0, 0, 1, 1], [], []>} : vector<48x16xf32>, vector<16x2xf32>, vector<48x2xf32> -> vector<48x2xf32>
    %42 = arith.addf %40, %41 : vector<48x2xf32>
    %43 = vector.broadcast %26 : vector<48x1xf32> to vector<48x2xf32>
    %44 = vector.broadcast %32 : vector<1x2xf32> to vector<48x2xf32>
    %45 = arith.mulf %43, %44 : vector<48x2xf32>
    %46 = arith.addf %42, %45 : vector<48x2xf32>
    %cst_22 = arith.constant 0.000000e+00 : f32
    %47 = vector.broadcast %cst_22 : f32 to vector<48x2xf32>
    %48 = arith.cmpf ogt, %46, %47 : vector<48x2xf32>
    %cst_23 = arith.constant 2.000000e-01 : f32
    %49 = vector.broadcast %cst_23 : f32 to vector<48x2xf32>
    %50 = arith.mulf %49, %46 : vector<48x2xf32>
    %51 = arith.select %48, %46, %50 : vector<48x2xi1>, vector<48x2xf32>
    %cst_24 = arith.constant 0.000000e+00 : f32
    %52 = vector.broadcast %cst_24 : f32 to vector<48x2xf32>
    %53 = arith.subf %52, %51 : vector<48x2xf32>
    %54 = math.exp %53 : vector<48x2xf32>
    %cst_25 = arith.constant dense<0.000000e+00> : vector<48x16xf32>
    %55 = tpu.matmul %54, %25, %cst_25 {dimension_numbers = #tpu.dot_dimension_numbers<[1], [0], [0], [1], [0, 0, 1, 1], [], []>} : vector<48x2xf32>, vector<2x16xf32>, vector<48x16xf32> -> vector<48x16xf32>
    %56 = arith.mulf %55, %37 : vector<48x16xf32>
    %57 = tpu.concatenate %56, %55 in 1 : vector<48x16xf32>, vector<48x16xf32> -> vector<48x32xf32>
    %58 = arith.truncf %57 : vector<48x32xf32> to vector<48x32xbf16>
    %cst_26 = arith.constant dense<0.000000e+00> : vector<24x32xf32>
    %59 = tpu.matmul %6, %58, %cst_26 {dimension_numbers = #tpu.dot_dimension_numbers<[0], [0], [1], [1], [0, 1, 1, 1], [], []>} : vector<48x24xbf16>, vector<48x32xbf16>, vector<24x32xf32> -> vector<24x32xf32>
    %60 = vector.extract_strided_slice %59 {offsets = [0, 0], sizes = [24, 16], strides = [1, 1]} : vector<24x32xf32> to vector<24x16xf32>
    %61 = vector.extract_strided_slice %59 {offsets = [0, 16], sizes = [24, 16], strides = [1, 1]} : vector<24x32xf32> to vector<24x16xf32>
    %cst_27 = arith.constant 0.000000e+00 : f32
    %62 = vector.broadcast %cst_27 : f32 to vector<24x16xf32>
    %63 = arith.cmpf ogt, %61, %62 : vector<24x16xf32>
    %cst_28 = arith.constant 1.000000e+00 : f32
    %64 = vector.broadcast %cst_28 : f32 to vector<24x16xf32>
    %65 = arith.select %63, %61, %64 : vector<24x16xi1>, vector<24x16xf32>
    %66 = tpu.reciprocal %65 {approx = true} : vector<24x16xf32> -> vector<24x16xf32>
    %67 = arith.mulf %60, %66 : vector<24x16xf32>
    %cst_29 = arith.constant 0.000000e+00 : f32
    %68 = vector.broadcast %cst_29 : f32 to vector<24x16xf32>
    %69 = arith.cmpf ogt, %67, %68 : vector<24x16xf32>
    %cst_30 = arith.constant 0.000000e+00 : f32
    %70 = vector.broadcast %cst_30 : f32 to vector<24x16xf32>
    %71 = arith.minimumf %67, %70 : vector<24x16xf32>
    %72 = math.exp %71 : vector<24x16xf32>
    %cst_31 = arith.constant 1.000000e+00 : f32
    %73 = vector.broadcast %cst_31 : f32 to vector<24x16xf32>
    %74 = arith.subf %72, %73 : vector<24x16xf32>
    %75 = arith.select %69, %67, %74 : vector<24x16xi1>, vector<24x16xf32>
    %c0_32 = arith.constant 0 : index
    %c0_33 = arith.constant 0 : index
    %76 = vector.load %arg6[%c0_32, %c0_33] : memref<16x64xf32, #tpu.memory_space<vmem>>, vector<16x64xf32>
    %c0_34 = arith.constant 0 : index
    %c0_35 = arith.constant 0 : index
    %77 = vector.load %arg7[%c0_34, %c0_35] : memref<64x1xf32, #tpu.memory_space<vmem>>, vector<64x1xf32>
    %c0_36 = arith.constant 0 : index
    %c0_37 = arith.constant 0 : index
    %78 = vector.load %arg8[%c0_36, %c0_37] : memref<64x1xf32, #tpu.memory_space<vmem>>, vector<64x1xf32>
    %c0_38 = arith.constant 0 : index
    %c0_39 = arith.constant 0 : index
    %79 = vector.load %arg9[%c0_38, %c0_39] : memref<1x1xf32, #tpu.memory_space<vmem>>, vector<1x1xf32>
    %cst_40 = arith.constant dense<0.000000e+00> : vector<24x64xf32>
    %80 = tpu.matmul %75, %76, %cst_40 {dimension_numbers = #tpu.dot_dimension_numbers<[1], [0], [0], [1], [0, 0, 1, 1], [], []>} : vector<24x16xf32>, vector<16x64xf32>, vector<24x64xf32> -> vector<24x64xf32>
    %81 = arith.truncf %80 : vector<24x64xf32> to vector<24x64xbf16>
    %cst_41 = arith.constant dense<0.000000e+00> : vector<48x64xf32>
    %82 = tpu.matmul %12, %81, %cst_41 {dimension_numbers = #tpu.dot_dimension_numbers<[1], [0], [0], [1], [0, 0, 1, 1], [], []>} : vector<48x24xbf16>, vector<24x64xbf16>, vector<48x64xf32> -> vector<48x64xf32>
    %cst_42 = arith.constant dense<0.000000e+00> : vector<24x1xf32>
    %83 = tpu.matmul %80, %77, %cst_42 {dimension_numbers = #tpu.dot_dimension_numbers<[1], [0], [0], [1], [0, 0, 1, 1], [], []>} : vector<24x64xf32>, vector<64x1xf32>, vector<24x1xf32> -> vector<24x1xf32>
    %84 = arith.truncf %83 : vector<24x1xf32> to vector<24x1xbf16>
    %cst_43 = arith.constant dense<0.000000e+00> : vector<48x1xf32>
    %85 = tpu.matmul %6, %84, %cst_43 {dimension_numbers = #tpu.dot_dimension_numbers<[1], [0], [0], [1], [0, 0, 1, 1], [], []>} : vector<48x24xbf16>, vector<24x1xbf16>, vector<48x1xf32> -> vector<48x1xf32>
    %cst_44 = arith.constant dense<0.000000e+00> : vector<48x1xf32>
    %86 = tpu.matmul %82, %78, %cst_44 {dimension_numbers = #tpu.dot_dimension_numbers<[1], [0], [0], [1], [0, 0, 1, 1], [], []>} : vector<48x64xf32>, vector<64x1xf32>, vector<48x1xf32> -> vector<48x1xf32>
    %87 = arith.addf %85, %86 : vector<48x1xf32>
    %88 = vector.broadcast %79 : vector<1x1xf32> to vector<48x1xf32>
    %89 = arith.mulf %26, %88 : vector<48x1xf32>
    %90 = arith.addf %87, %89 : vector<48x1xf32>
    %cst_45 = arith.constant 0.000000e+00 : f32
    %91 = vector.broadcast %cst_45 : f32 to vector<48x1xf32>
    %92 = arith.cmpf ogt, %90, %91 : vector<48x1xf32>
    %cst_46 = arith.constant 2.000000e-01 : f32
    %93 = vector.broadcast %cst_46 : f32 to vector<48x1xf32>
    %94 = arith.mulf %93, %90 : vector<48x1xf32>
    %95 = arith.select %92, %90, %94 : vector<48x1xi1>, vector<48x1xf32>
    %cst_47 = arith.constant 0.000000e+00 : f32
    %96 = vector.broadcast %cst_47 : f32 to vector<48x1xf32>
    %97 = arith.subf %96, %95 : vector<48x1xf32>
    %98 = math.exp %97 : vector<48x1xf32>
    %99 = vector.broadcast %98 : vector<48x1xf32> to vector<48x64xf32>
    %100 = arith.mulf %99, %82 : vector<48x64xf32>
    %101 = tpu.concatenate %100, %98 in 1 : vector<48x64xf32>, vector<48x1xf32> -> vector<48x65xf32>
    %102 = arith.truncf %101 : vector<48x65xf32> to vector<48x65xbf16>
    %cst_48 = arith.constant dense<0.000000e+00> : vector<24x65xf32>
    %103 = tpu.matmul %6, %102, %cst_48 {dimension_numbers = #tpu.dot_dimension_numbers<[0], [0], [1], [1], [0, 1, 1, 1], [], []>} : vector<48x24xbf16>, vector<48x65xbf16>, vector<24x65xf32> -> vector<24x65xf32>
    %104 = vector.extract_strided_slice %103 {offsets = [0, 0], sizes = [24, 64], strides = [1, 1]} : vector<24x65xf32> to vector<24x64xf32>
    %105 = vector.extract_strided_slice %103 {offsets = [0, 64], sizes = [24, 1], strides = [1, 1]} : vector<24x65xf32> to vector<24x1xf32>
    %cst_49 = arith.constant 0.000000e+00 : f32
    %106 = vector.broadcast %cst_49 : f32 to vector<24x1xf32>
    %107 = arith.cmpf ogt, %105, %106 : vector<24x1xf32>
    %cst_50 = arith.constant 1.000000e+00 : f32
    %108 = vector.broadcast %cst_50 : f32 to vector<24x1xf32>
    %109 = arith.select %107, %105, %108 : vector<24x1xi1>, vector<24x1xf32>
    %110 = tpu.reciprocal %109 {approx = true} : vector<24x1xf32> -> vector<24x1xf32>
    %111 = vector.broadcast %110 : vector<24x1xf32> to vector<24x64xf32>
    %112 = arith.mulf %104, %111 : vector<24x64xf32>
    %cst_51 = arith.constant dense<0.000000e+00> : vector<48xf32>
    %113 = vector.multi_reduction <add>, %54, %cst_51 [1] : vector<48x2xf32> to vector<48xf32>
    %114 = vector.shape_cast %113 : vector<48xf32> to vector<48x1xf32>
    %cst_52 = arith.constant 2.000000e+00 : f32
    %115 = vector.broadcast %cst_52 : f32 to vector<48x1xf32>
    %116 = arith.divf %114, %115 : vector<48x1xf32>
    %c0_53 = arith.constant 0 : index
    %c0_54 = arith.constant 0 : index
    %117 = vector.load %arg10[%c0_53, %c0_54] : memref<64x16xf32, #tpu.memory_space<vmem>>, vector<64x16xf32>
    %c0_55 = arith.constant 0 : index
    %c0_56 = arith.constant 0 : index
    %118 = vector.load %arg11[%c0_55, %c0_56] : memref<16x2xf32, #tpu.memory_space<vmem>>, vector<16x2xf32>
    %c0_57 = arith.constant 0 : index
    %c0_58 = arith.constant 0 : index
    %119 = vector.load %arg12[%c0_57, %c0_58] : memref<16x2xf32, #tpu.memory_space<vmem>>, vector<16x2xf32>
    %c0_59 = arith.constant 0 : index
    %c0_60 = arith.constant 0 : index
    %120 = vector.load %arg13[%c0_59, %c0_60] : memref<1x2xf32, #tpu.memory_space<vmem>>, vector<1x2xf32>
    %cst_61 = arith.constant dense<0.000000e+00> : vector<24x16xf32>
    %121 = tpu.matmul %112, %117, %cst_61 {dimension_numbers = #tpu.dot_dimension_numbers<[1], [0], [0], [1], [0, 0, 1, 1], [], []>} : vector<24x64xf32>, vector<64x16xf32>, vector<24x16xf32> -> vector<24x16xf32>
    %122 = arith.truncf %121 : vector<24x16xf32> to vector<24x16xbf16>
    %cst_62 = arith.constant dense<0.000000e+00> : vector<48x16xf32>
    %123 = tpu.matmul %6, %122, %cst_62 {dimension_numbers = #tpu.dot_dimension_numbers<[1], [0], [0], [1], [0, 0, 1, 1], [], []>} : vector<48x24xbf16>, vector<24x16xbf16>, vector<48x16xf32> -> vector<48x16xf32>
    %cst_63 = arith.constant dense<0.000000e+00> : vector<24x2xf32>
    %124 = tpu.matmul %121, %118, %cst_63 {dimension_numbers = #tpu.dot_dimension_numbers<[1], [0], [0], [1], [0, 0, 1, 1], [], []>} : vector<24x16xf32>, vector<16x2xf32>, vector<24x2xf32> -> vector<24x2xf32>
    %125 = arith.truncf %124 : vector<24x2xf32> to vector<24x2xbf16>
    %cst_64 = arith.constant dense<0.000000e+00> : vector<48x2xf32>
    %126 = tpu.matmul %12, %125, %cst_64 {dimension_numbers = #tpu.dot_dimension_numbers<[1], [0], [0], [1], [0, 0, 1, 1], [], []>} : vector<48x24xbf16>, vector<24x2xbf16>, vector<48x2xf32> -> vector<48x2xf32>
    %cst_65 = arith.constant dense<0.000000e+00> : vector<48x2xf32>
    %127 = tpu.matmul %123, %119, %cst_65 {dimension_numbers = #tpu.dot_dimension_numbers<[1], [0], [0], [1], [0, 0, 1, 1], [], []>} : vector<48x16xf32>, vector<16x2xf32>, vector<48x2xf32> -> vector<48x2xf32>
    %128 = arith.addf %126, %127 : vector<48x2xf32>
    %129 = vector.broadcast %116 : vector<48x1xf32> to vector<48x2xf32>
    %130 = vector.broadcast %120 : vector<1x2xf32> to vector<48x2xf32>
    %131 = arith.mulf %129, %130 : vector<48x2xf32>
    %132 = arith.addf %128, %131 : vector<48x2xf32>
    %cst_66 = arith.constant 0.000000e+00 : f32
    %133 = vector.broadcast %cst_66 : f32 to vector<48x2xf32>
    %134 = arith.cmpf ogt, %132, %133 : vector<48x2xf32>
    %cst_67 = arith.constant 2.000000e-01 : f32
    %135 = vector.broadcast %cst_67 : f32 to vector<48x2xf32>
    %136 = arith.mulf %135, %132 : vector<48x2xf32>
    %137 = arith.select %134, %132, %136 : vector<48x2xi1>, vector<48x2xf32>
    %cst_68 = arith.constant 0.000000e+00 : f32
    %138 = vector.broadcast %cst_68 : f32 to vector<48x2xf32>
    %139 = arith.subf %138, %137 : vector<48x2xf32>
    %140 = math.exp %139 : vector<48x2xf32>
    %cst_69 = arith.constant dense<0.000000e+00> : vector<48x16xf32>
    %141 = tpu.matmul %140, %25, %cst_69 {dimension_numbers = #tpu.dot_dimension_numbers<[1], [0], [0], [1], [0, 0, 1, 1], [], []>} : vector<48x2xf32>, vector<2x16xf32>, vector<48x16xf32> -> vector<48x16xf32>
    %142 = arith.mulf %141, %123 : vector<48x16xf32>
    %143 = tpu.concatenate %142, %141 in 1 : vector<48x16xf32>, vector<48x16xf32> -> vector<48x32xf32>
    %144 = arith.truncf %143 : vector<48x32xf32> to vector<48x32xbf16>
    %cst_70 = arith.constant dense<0.000000e+00> : vector<24x32xf32>
    %145 = tpu.matmul %12, %144, %cst_70 {dimension_numbers = #tpu.dot_dimension_numbers<[0], [0], [1], [1], [0, 1, 1, 1], [], []>} : vector<48x24xbf16>, vector<48x32xbf16>, vector<24x32xf32> -> vector<24x32xf32>
    %146 = vector.extract_strided_slice %145 {offsets = [0, 0], sizes = [24, 16], strides = [1, 1]} : vector<24x32xf32> to vector<24x16xf32>
    %147 = vector.extract_strided_slice %145 {offsets = [0, 16], sizes = [24, 16], strides = [1, 1]} : vector<24x32xf32> to vector<24x16xf32>
    %cst_71 = arith.constant 0.000000e+00 : f32
    %148 = vector.broadcast %cst_71 : f32 to vector<24x16xf32>
    %149 = arith.cmpf ogt, %147, %148 : vector<24x16xf32>
    %cst_72 = arith.constant 1.000000e+00 : f32
    %150 = vector.broadcast %cst_72 : f32 to vector<24x16xf32>
    %151 = arith.select %149, %147, %150 : vector<24x16xi1>, vector<24x16xf32>
    %152 = tpu.reciprocal %151 {approx = true} : vector<24x16xf32> -> vector<24x16xf32>
    %153 = arith.mulf %146, %152 : vector<24x16xf32>
    %cst_73 = arith.constant 0.000000e+00 : f32
    %154 = vector.broadcast %cst_73 : f32 to vector<24x16xf32>
    %155 = arith.cmpf ogt, %153, %154 : vector<24x16xf32>
    %cst_74 = arith.constant 0.000000e+00 : f32
    %156 = vector.broadcast %cst_74 : f32 to vector<24x16xf32>
    %157 = arith.minimumf %153, %156 : vector<24x16xf32>
    %158 = math.exp %157 : vector<24x16xf32>
    %cst_75 = arith.constant 1.000000e+00 : f32
    %159 = vector.broadcast %cst_75 : f32 to vector<24x16xf32>
    %160 = arith.subf %158, %159 : vector<24x16xf32>
    %161 = arith.select %155, %153, %160 : vector<24x16xi1>, vector<24x16xf32>
    %c0_76 = arith.constant 0 : index
    %c0_77 = arith.constant 0 : index
    %162 = vector.load %arg14[%c0_76, %c0_77] : memref<16x64xf32, #tpu.memory_space<vmem>>, vector<16x64xf32>
    %c0_78 = arith.constant 0 : index
    %c0_79 = arith.constant 0 : index
    %163 = vector.load %arg15[%c0_78, %c0_79] : memref<64x1xf32, #tpu.memory_space<vmem>>, vector<64x1xf32>
    %c0_80 = arith.constant 0 : index
    %c0_81 = arith.constant 0 : index
    %164 = vector.load %arg16[%c0_80, %c0_81] : memref<64x1xf32, #tpu.memory_space<vmem>>, vector<64x1xf32>
    %c0_82 = arith.constant 0 : index
    %c0_83 = arith.constant 0 : index
    %165 = vector.load %arg17[%c0_82, %c0_83] : memref<1x1xf32, #tpu.memory_space<vmem>>, vector<1x1xf32>
    %cst_84 = arith.constant dense<0.000000e+00> : vector<24x64xf32>
    %166 = tpu.matmul %161, %162, %cst_84 {dimension_numbers = #tpu.dot_dimension_numbers<[1], [0], [0], [1], [0, 0, 1, 1], [], []>} : vector<24x16xf32>, vector<16x64xf32>, vector<24x64xf32> -> vector<24x64xf32>
    %167 = arith.truncf %166 : vector<24x64xf32> to vector<24x64xbf16>
    %cst_85 = arith.constant dense<0.000000e+00> : vector<48x64xf32>
    %168 = tpu.matmul %6, %167, %cst_85 {dimension_numbers = #tpu.dot_dimension_numbers<[1], [0], [0], [1], [0, 0, 1, 1], [], []>} : vector<48x24xbf16>, vector<24x64xbf16>, vector<48x64xf32> -> vector<48x64xf32>
    %cst_86 = arith.constant dense<0.000000e+00> : vector<24x1xf32>
    %169 = tpu.matmul %166, %163, %cst_86 {dimension_numbers = #tpu.dot_dimension_numbers<[1], [0], [0], [1], [0, 0, 1, 1], [], []>} : vector<24x64xf32>, vector<64x1xf32>, vector<24x1xf32> -> vector<24x1xf32>
    %170 = arith.truncf %169 : vector<24x1xf32> to vector<24x1xbf16>
    %cst_87 = arith.constant dense<0.000000e+00> : vector<48x1xf32>
    %171 = tpu.matmul %12, %170, %cst_87 {dimension_numbers = #tpu.dot_dimension_numbers<[1], [0], [0], [1], [0, 0, 1, 1], [], []>} : vector<48x24xbf16>, vector<24x1xbf16>, vector<48x1xf32> -> vector<48x1xf32>
    %cst_88 = arith.constant dense<0.000000e+00> : vector<48x1xf32>
    %172 = tpu.matmul %168, %164, %cst_88 {dimension_numbers = #tpu.dot_dimension_numbers<[1], [0], [0], [1], [0, 0, 1, 1], [], []>} : vector<48x64xf32>, vector<64x1xf32>, vector<48x1xf32> -> vector<48x1xf32>
    %173 = arith.addf %171, %172 : vector<48x1xf32>
    %174 = vector.broadcast %165 : vector<1x1xf32> to vector<48x1xf32>
    %175 = arith.mulf %116, %174 : vector<48x1xf32>
    %176 = arith.addf %173, %175 : vector<48x1xf32>
    %cst_89 = arith.constant 0.000000e+00 : f32
    %177 = vector.broadcast %cst_89 : f32 to vector<48x1xf32>
    %178 = arith.cmpf ogt, %176, %177 : vector<48x1xf32>
    %cst_90 = arith.constant 2.000000e-01 : f32
    %179 = vector.broadcast %cst_90 : f32 to vector<48x1xf32>
    %180 = arith.mulf %179, %176 : vector<48x1xf32>
    %181 = arith.select %178, %176, %180 : vector<48x1xi1>, vector<48x1xf32>
    %cst_91 = arith.constant 0.000000e+00 : f32
    %182 = vector.broadcast %cst_91 : f32 to vector<48x1xf32>
    %183 = arith.subf %182, %181 : vector<48x1xf32>
    %184 = math.exp %183 : vector<48x1xf32>
    %185 = vector.broadcast %184 : vector<48x1xf32> to vector<48x64xf32>
    %186 = arith.mulf %185, %168 : vector<48x64xf32>
    %187 = tpu.concatenate %186, %184 in 1 : vector<48x64xf32>, vector<48x1xf32> -> vector<48x65xf32>
    %188 = arith.truncf %187 : vector<48x65xf32> to vector<48x65xbf16>
    %cst_92 = arith.constant dense<0.000000e+00> : vector<24x65xf32>
    %189 = tpu.matmul %12, %188, %cst_92 {dimension_numbers = #tpu.dot_dimension_numbers<[0], [0], [1], [1], [0, 1, 1, 1], [], []>} : vector<48x24xbf16>, vector<48x65xbf16>, vector<24x65xf32> -> vector<24x65xf32>
    %190 = vector.extract_strided_slice %189 {offsets = [0, 0], sizes = [24, 64], strides = [1, 1]} : vector<24x65xf32> to vector<24x64xf32>
    %191 = vector.extract_strided_slice %189 {offsets = [0, 64], sizes = [24, 1], strides = [1, 1]} : vector<24x65xf32> to vector<24x1xf32>
    %cst_93 = arith.constant 0.000000e+00 : f32
    %192 = vector.broadcast %cst_93 : f32 to vector<24x1xf32>
    %193 = arith.cmpf ogt, %191, %192 : vector<24x1xf32>
    %cst_94 = arith.constant 1.000000e+00 : f32
    %194 = vector.broadcast %cst_94 : f32 to vector<24x1xf32>
    %195 = arith.select %193, %191, %194 : vector<24x1xi1>, vector<24x1xf32>
    %196 = tpu.reciprocal %195 {approx = true} : vector<24x1xf32> -> vector<24x1xf32>
    %197 = vector.broadcast %196 : vector<24x1xf32> to vector<24x64xf32>
    %198 = arith.mulf %190, %197 : vector<24x64xf32>
    %cst_95 = arith.constant dense<0.000000e+00> : vector<48xf32>
    %199 = vector.multi_reduction <add>, %140, %cst_95 [1] : vector<48x2xf32> to vector<48xf32>
    %200 = vector.shape_cast %199 : vector<48xf32> to vector<48x1xf32>
    %cst_96 = arith.constant 2.000000e+00 : f32
    %201 = vector.broadcast %cst_96 : f32 to vector<48x1xf32>
    %202 = arith.divf %200, %201 : vector<48x1xf32>
    %c0_97 = arith.constant 0 : index
    %c0_98 = arith.constant 0 : index
    %203 = vector.load %arg18[%c0_97, %c0_98] : memref<64x64xf32, #tpu.memory_space<vmem>>, vector<64x64xf32>
    %cst_99 = arith.constant dense<0.000000e+00> : vector<24x64xf32>
    %204 = tpu.matmul %198, %203, %cst_99 {dimension_numbers = #tpu.dot_dimension_numbers<[1], [0], [0], [1], [0, 0, 1, 1], [], []>} : vector<24x64xf32>, vector<64x64xf32>, vector<24x64xf32> -> vector<24x64xf32>
    %c0_100 = arith.constant 0 : index
    %c0_101 = arith.constant 0 : index
    %205 = vector.load %arg19[%c0_100, %c0_101] : memref<1x64xf32, #tpu.memory_space<vmem>>, vector<1x64xf32>
    %206 = vector.broadcast %205 : vector<1x64xf32> to vector<24x64xf32>
    %207 = arith.addf %204, %206 : vector<24x64xf32>
    %cst_102 = arith.constant 0.000000e+00 : f32
    %208 = vector.broadcast %cst_102 : f32 to vector<24x64xf32>
    %209 = arith.maximumf %207, %208 : vector<24x64xf32>
    %c0_103 = arith.constant 0 : index
    %c0_104 = arith.constant 0 : index
    %210 = vector.load %arg20[%c0_103, %c0_104] : memref<64x64xf32, #tpu.memory_space<vmem>>, vector<64x64xf32>
    %cst_105 = arith.constant dense<0.000000e+00> : vector<24x64xf32>
    %211 = tpu.matmul %209, %210, %cst_105 {dimension_numbers = #tpu.dot_dimension_numbers<[1], [0], [0], [1], [0, 0, 1, 1], [], []>} : vector<24x64xf32>, vector<64x64xf32>, vector<24x64xf32> -> vector<24x64xf32>
    %c0_106 = arith.constant 0 : index
    %c0_107 = arith.constant 0 : index
    %212 = vector.load %arg21[%c0_106, %c0_107] : memref<1x64xf32, #tpu.memory_space<vmem>>, vector<1x64xf32>
    %213 = vector.broadcast %212 : vector<1x64xf32> to vector<24x64xf32>
    %214 = arith.addf %211, %213 : vector<24x64xf32>
    %cst_108 = arith.constant 0.000000e+00 : f32
    %215 = vector.broadcast %cst_108 : f32 to vector<24x64xf32>
    %216 = arith.maximumf %214, %215 : vector<24x64xf32>
    %c0_109 = arith.constant 0 : index
    %c0_110 = arith.constant 0 : index
    %217 = vector.load %arg22[%c0_109, %c0_110] : memref<64x1xf32, #tpu.memory_space<vmem>>, vector<64x1xf32>
    %cst_111 = arith.constant dense<0.000000e+00> : vector<24x1xf32>
    %218 = tpu.matmul %216, %217, %cst_111 {dimension_numbers = #tpu.dot_dimension_numbers<[1], [0], [0], [1], [0, 0, 1, 1], [], []>} : vector<24x64xf32>, vector<64x1xf32>, vector<24x1xf32> -> vector<24x1xf32>
    %cst_112 = arith.constant 0.000000e+00 : f32
    %219 = vector.broadcast %cst_112 : f32 to vector<24x1xf32>
    %220 = arith.subf %219, %218 : vector<24x1xf32>
    %221 = math.exp %220 : vector<24x1xf32>
    %cst_113 = arith.constant 1.000000e+00 : f32
    %222 = vector.broadcast %cst_113 : f32 to vector<24x1xf32>
    %223 = arith.addf %222, %221 : vector<24x1xf32>
    %cst_114 = arith.constant 1.000000e+00 : f32
    %224 = vector.broadcast %cst_114 : f32 to vector<24x1xf32>
    %225 = arith.divf %224, %223 : vector<24x1xf32>
    %c0_115 = arith.constant 0 : index
    %c0_116 = arith.constant 0 : index
    %226 = vector.load %arg28[%c0_115, %c0_116] : memref<24x1xf32, #tpu.memory_space<vmem>>, vector<24x1xf32>
    tpu.vector_store %arg28[%c0_115, %c0_116], %225 {strides = array<i32>} : memref<24x1xf32, #tpu.memory_space<vmem>>, vector<24x1xf32>,
    %c0_117 = arith.constant 0 : index
    %c0_118 = arith.constant 0 : index
    %227 = vector.load %arg29[%c0_117, %c0_118] : memref<48x1xf32, #tpu.memory_space<vmem>>, vector<48x1xf32>
    tpu.vector_store %arg29[%c0_117, %c0_118], %202 {strides = array<i32>} : memref<48x1xf32, #tpu.memory_space<vmem>>, vector<48x1xf32>,
    return
  }
}

</mosaic_0001>

<bundles_post_ra>
// kernel: tpu_custom_call.1
= control target key start
LH: loop header
LB: loop body
LE: loop exit
PB: predicated region body
PF: predicated region fallthrough
CT: control target
= control target key end

     0   :  { %v2492_v0 = vmov 0   ;;  %s2493_s3 = smov 24   ;;  %s2494_s7 = smov 1   ;;  %vm257_vm0 = vcmask 1045504   ;;  %vm247_vm1 = vcmask 48128   ;;  %vm327_vm2 = vcmask 130048   ;;  %s3185_s0 = inlined_call_operand.smem [shape: u32[30], index: -1, kind: input, shape index: {}] }
   0x1   :  { %2319 = vset.pattern.permute.xlu0 %v2492_v0  ;;  %s2534_s6 = sld [smem:[%s3185_s0 + %s2493_s3]]   ;;  %2320 = vset.pattern.permute.xlu1 %v2492_v0  ;;  %s2495_s14 = smov 9   ;;  %v126_v32 = vlaneseq  ;;  %vm299_vm3 = vcmask 1043456   ;;  %v2501_v39 = vmov 0.0   ;;  %vm289_vm6 = vcmask 195584  }
   0x2   :  { %s2126_s10 = sld [smem:[%s3185_s0 + %s2494_s7]]   ;;  %2321 = vset.pattern.permute.xlu2 %v2492_v0  ;;  %s2496_s18 = smov 2  }
   0x3   :  { %s2544_s13 = sld [smem:[%s3185_s0]]   ;;  %s2497_s22 = smov 23   ;;  %v2602_v34 = vand.u32 127, %v126_v32 }
   0x4   :  { %s2134_s17 = sld [smem:[%s3185_s0 + %s2495_s14]]   ;;  %s2498_s26 = smov 5  }
   0x5   :  { %s2554_s21 = sld [smem:[%s3185_s0 + %s2496_s18]]   ;;  %s2499_s30 = smov 27  }
   0x6   :  { %s2148_s25 = sld [smem:[%s3185_s0 + %s2497_s22]]   ;;  %s2500_s4 = smov 3  }
   0x7   :  { %v173_v1 = vld [vmem:[%s2534_s6] sm:$0xff]  ;;  %v175_v2 = vld [vmem:[%s2534_s6 + $0x10] sm:$0xff]  ;;  %v174_v7 = vld [vmem:[%s2534_s6 + $0x8] sm:$0xff]  ;;  %s2570_s29 = sld [smem:[%s3185_s0 + %s2498_s26]]   ;;  %s2502_s8 = smov 4  }
   0x8   :  { %180 = vperm.xlu0 %2319, %v173_v1   ;;  %v237_v3 = vld [vmem:[%s2126_s10] sm:$0x3f]  ;;  %186 = vperm.xlu1 %2320, %v175_v2   ;;  %v176_v8 = vld [vmem:[%s2534_s6 + $0x18] sm:$0xff]  ;;  %v178_v10 = vld [vmem:[%s2534_s6 + $0x28] sm:$0xff]  ;;  %s2150_s3 = sld [smem:[%s3185_s0 + %s2499_s30]]   ;;  %s2503_s12 = smov 16  }
   0x9   :  { %v177_v4 = vld [vmem:[%s2534_s6 + $0x20] sm:$0xff]  ;;  %2166 = vmatpush.msk.msra.mxu0 %vm257_vm0, %v237_v3  ;;  %v235_v9 = vld [vmem:[%s2544_s13 + $0x8] sm:$0xff]  ;;  %v236_v14 = vld [vmem:[%s2544_s13 + $0x10] sm:$0xff]  ;;  %s2128_s7 = sld [smem:[%s3185_s0 + %s2500_s4]]   ;;  %s2507_s22 = smov 6  }
   0xa   :  { %v234_v5 = vld [vmem:[%s2544_s13] sm:$0xff]  ;;  %192 = vperm.xlu2 %2321, %v177_v4   ;;  %v65_v6 = vstv %s2134_s17  ;;  %s2129_s11 = sld [smem:[%s3185_s0 + %s2502_s8]]   ;;  %s2504_s13 = smov 13  }
   0xb   :  { %2167 = vmatmul.msk.f32.vlgmr.msra.gmra.mxu0 %vm247_vm1, %v234_v5  ;;  %66 = vst [vmem:[#allocation2] sm:$0x1] %v65_v6  ;;  %v2388_v26 = vld [vmem:[%s2554_s21] ss:$0 sm:$0xff]  ;;  %s2732_s16 = sld [smem:[%s3185_s0 + %s2504_s13]]   ;;  %s2505_s17 = smov 17  }
   0xc   :  { %v128_v11 = vld [vmem:[%s2148_s25] sm:$0xff]  ;;  %v129_v12 = vld [vmem:[%s2148_s25 + $0x8] sm:$0xff]  ;;  %v130_v13 = vld [vmem:[%s2148_s25 + $0x10] sm:$0xff]  ;;  %s2142_s20 = sld [smem:[%s3185_s0 + %s2505_s17]]   ;;  %s2506_s21 = smov 112  }
   0xd   :  { %v131_v15 = vld [vmem:[%s2148_s25 + $0x18] sm:$0xff]  ;;  %v132_v16 = vld [vmem:[%s2148_s25 + $0x20] sm:$0xff]  ;;  %v133_v17 = vld [vmem:[%s2148_s25 + $0x28] sm:$0xff]  ;;  %s2131_s25 = sld [smem:[%s3185_s0 + %s2507_s22]]   ;;  %s2508_s26 = smov 7  }
   0xe   :  { %v2577_v18 = vld [vmem:[%s2150_s3] sm:$0xff]  ;;  %v2579_v19 = vld [vmem:[%s2150_s3 + $0x8] sm:$0xff]  ;;  %v2581_v20 = vld [vmem:[%s2150_s3 + $0x10] sm:$0xff]  ;;  %s2509_s30 = smov 8   ;;  %s2510_s4 = smov 64  }
   0xf   :  { %v2586_v21 = vld [vmem:[%s2150_s3 + $0x18] sm:$0xff]  ;;  %v2588_v22 = vld [vmem:[%s2150_s3 + $0x20] sm:$0xff]  ;;  %v2590_v23 = vld [vmem:[%s2150_s3 + $0x28] sm:$0xff]  ;;  %s2133_s3 = sld [smem:[%s3185_s0 + %s2509_s30]]   ;;  %s2512_s5 = smov 10  }
  0x10   :  { %183 = vperm.xlu0 %2319, %v174_v7   ;;  %189 = vperm.xlu1 %2320, %v176_v8   ;;  %v240_v24 = vld [vmem:[%s2128_s7 + $0x8] sm:$0xff]  ;;  %v239_v25 = vld [vmem:[%s2128_s7] sm:$0xff]  ;;  %s2135_s8 = sld [smem:[%s3185_s0 + %s2512_s5]]   ;;  %s2513_s9 = smov 11  }
  0x11   :  { %351 = vmatpush.msra.mxu2 %v240_v24  ;;  %v242_v54 = vld [vmem:[%s2129_s11 + $0x8] sm:$0xff]  ;;  %v241_v55 = vld [vmem:[%s2129_s11] sm:$0xff]  ;;  %s2136_s13 = sld [smem:[%s3185_s0 + %s2513_s9]]   ;;  %s2514_s14 = smov 12  }
  0x12   :  { %195 = vperm.xlu2 %2321, %v178_v10   ;;  %397 = vmatpush.msra.mxu3 %v242_v54  ;;  %s2137_s18 = sld [smem:[%s3185_s0 + %s2514_s14]]   ;;  %s2517_s23 = smov 15  }
  0x13   :  { %2168 = vmatmul.msk.f32.gmra.mxu0 %vm247_vm1, %v235_v9  ;;  %352 = vmatpush.msra.mxu2 %v239_v25  ;;  %s2141_s28 = sld [smem:[%s3185_s0 + %s2503_s12]]   ;;  %s2519_s2 = smov 18  }
  0x14   :  { %398 = vmatpush.msra.mxu3 %v241_v55  ;;  %s2143_s5 = sld [smem:[%s3185_s0 + %s2519_s2]]   ;;  %s2520_s6 = smov 21  }
  0x15   :  { %s3123_s9 = sld [smem:[%s3185_s0 + %s2520_s6]]   ;;  %s2521_s10 = smov 20  }
  0x16   :  { %s3128_s14 = sld [smem:[%s3185_s0 + %s2521_s10]]   ;;  %s2522_s15 = smov 29  }
  0x17   :  { %s2523_s19 = smov 22   ;;  %s2524_s24 = smov 28  }
  0x18   :  { %135 = vperm.xlu0 %2319, %v128_v11   ;;  %138 = vperm.xlu1 %2320, %v129_v12  }
  0x1a   :  { %141 = vperm.xlu2 %2321, %v130_v13  }
  0x1b   :  { %2169 = vmatmul.msk.f32.gmra.mxu0 %vm247_vm1, %v236_v14 }
  0x20   :  { %144 = vperm.xlu0 %2319, %v131_v15   ;;  %147 = vperm.xlu1 %2320, %v132_v16  }
  0x22   :  { %150 = vperm.xlu2 %2321, %v133_v17  }
  0x28   :  { %456 = vperm.xlu0 %2319, %v2577_v18   ;;  %461 = vperm.xlu1 %2320, %v2579_v19  }
  0x2a   :  { %466 = vperm.xlu2 %2321, %v2581_v20  }
  0x30   :  { %471 = vperm.xlu0 %2319, %v2586_v21   ;;  %476 = vperm.xlu1 %2320, %v2588_v22  }
  0x32   :  { %481 = vperm.xlu2 %2321, %v2590_v23  }
  0x64   :  { %v193_v48 = vpop.permute.xlu2 %192 }
  0x65   :  { %vm201_vm9 = vcmp.eq.s32.totalorder %v2602_v34, %v193_v48 }
  0x66   :  { %v2163_v51 = vsel %vm201_vm9, 1.0, %v2501_v39 }
  0x6c   :  { %v196_v50 = vpop.permute.xlu2 %195 }
  0x6d   :  { %vm202_vm10 = vcmp.eq.s32.totalorder %v2602_v34, %v196_v50 }
  0x6e   :  { %v2164_v52 = vsel %vm202_vm10, 1.0, %v2501_v39  ;;  %vm535_vm10 = vcmask 15360  }
  0x6f   :  { %v2626_v53 = vpack.c.bf16 %v2164_v52, %v2163_v51 }
  0x74   :  { %v142_v6 = vpop.permute.xlu2 %141 }
  0x75   :  { %vm154_vm14 = vcmp.eq.s32.totalorder %v2602_v34, %v142_v6 }
  0x76   :  { %v2155_v10 = vsel %vm154_vm14, 1.0, %v2501_v39 }
  0x7a   :  { %v181_v31 = vpop.permute.xlu0 %180  ;;  %v187_v43 = vpop.permute.xlu1 %186 }
  0x7b   :  { %vm197_vm4 = vcmp.eq.s32.totalorder %v2602_v34, %v181_v31  ;;  %vm199_vm7 = vcmp.eq.s32.totalorder %v2602_v34, %v187_v43  ;;  %v2691_v31 = vld [vmem:[%s2570_s29] ss:$0 sm:$0xff]  ;;  %s2768_s29 = sld [smem:[%s3185_s0 + %s2508_s26]]  }
  0x7c   :  { %v2159_v40 = vsel %vm197_vm4, 1.0, %v2501_v39  ;;  %v2161_v46 = vsel %vm199_vm7, 1.0, %v2501_v39  ;;  %v151_v13 = vpop.permute.xlu2 %150  ;;  %vm554_vm7 = vcmask 1041408   ;;  %s3012_s26 = sld [smem:[%s3185_s0 + %s2517_s23]]  }
  0x7d   :  { %vm157_vm0 = vcmp.eq.s32.totalorder %v2602_v34, %v151_v13  ;;  %s3156_s23 = sld [smem:[%s3185_s0 + %s2523_s19]]  }
  0x7e   :  { %v2158_v17 = vsel %vm157_vm0, 1.0, %v2501_v39 }
  0x82   :  { %v184_v37 = vpop.permute.xlu0 %183  ;;  %v190_v45 = vpop.permute.xlu1 %189 }
  0x83   :  { %vm198_vm5 = vcmp.eq.s32.totalorder %v2602_v34, %v184_v37  ;;  %vm200_vm8 = vcmp.eq.s32.totalorder %v2602_v34, %v190_v45 }
  0x84   :  { %v2160_v41 = vsel %vm198_vm5, 1.0, %v2501_v39  ;;  %v2162_v47 = vsel %vm200_vm8, 1.0, %v2501_v39  ;;  %v467_v51 = vpop.permute.xlu2 %466 }
  0x85   :  { %v2610_v44 = vpack.c.bf16 %v2160_v41, %v2159_v40  ;;  %v2618_v49 = vpack.c.bf16 %v2162_v47, %v2161_v46 }
  0x88   :  { %v278_v27 = vpop.f32.mrf.mxu0 }
  0x89   :  { %v279_v28 = vadd.f32 %v2388_v26, %v278_v27 }
  0x8a   :  { %v136_v60 = vpop.permute.xlu0 %135  ;;  %v139_v61 = vpop.permute.xlu1 %138 }
  0x8b   :  { %2173 = vmatmul.msk.f32.vlgmr.msra.gmra.mxu2 %vm327_vm2, %v279_v28  ;;  %vm152_vm11 = vcmp.eq.s32.totalorder %v2602_v34, %v136_v60  ;;  %vm153_vm12 = vcmp.eq.s32.totalorder %v2602_v34, %v139_v61 }
  0x8c   :  { %v2153_v1 = vsel %vm152_vm11, 1.0, %v2501_v39  ;;  %v2154_v2 = vsel %vm153_vm12, 1.0, %v2501_v39 }
  0x8d   :  { %v2642_v4 = vpack.c.bf16 %v2154_v2, %v2153_v1 }
  0x90   :  { %v281_v29 = vpop.f32.mrf.mxu0 }
  0x91   :  { %v282_v30 = vadd.f32 %v2388_v26, %v281_v29 }
  0x92   :  { %v145_v7 = vpop.permute.xlu0 %144  ;;  %v148_v14 = vpop.permute.xlu1 %147 }
  0x93   :  { %2174 = vmatmul.msk.f32.gmra.mxu2 %vm327_vm2, %v282_v30  ;;  %v287_v42 = vpack.c.bf16 %v282_v30, %v279_v28  ;;  %vm155_vm13 = vcmp.eq.s32.totalorder %v2602_v34, %v145_v7  ;;  %vm156_vm15 = vcmp.eq.s32.totalorder %v2602_v34, %v148_v14 }
  0x94   :  { %v2156_v9 = vsel %vm155_vm13, 1.0, %v2501_v39  ;;  %v2157_v16 = vsel %vm156_vm15, 1.0, %v2501_v39  ;;  %vm648_vm15 = vcmask 392192  }
  0x95   :  { %v2658_v11 = vpack.c.bf16 %v2156_v9, %v2155_v10  ;;  %v2674_v24 = vpack.c.bf16 %v2158_v17, %v2157_v16 }
  0x98   :  { %v284_v33 = vpop.f32.mrf.mxu0 }
  0x99   :  { %v285_v35 = vadd.f32 %v2388_v26, %v284_v33  ;;  %v219_v26 = vshrl.u32 %v126_v32, 7 }
  0x9a   :  { %v457_v33 = vpop.permute.xlu0 %456 }
  0x9b   :  { %2175 = vmatmul.msk.f32.gmra.mxu2 %vm327_vm2, %v285_v35  ;;  %v288_v36 = vpack.c.bf16 %v285_v35, %v285_v35  ;;  %v222_v27 = vadd.s32 1, %v219_v26  ;;  %v220_v28 = vmul.u32 8, %v219_v26 }
  0x9d   :  { %v301_v38 = vsel %vm299_vm3, %v288_v36, 0  ;;  %v223_v29 = vmul.u32 8, %v222_v27  ;;  %vm221_vm1 = vcmp.ge.s32.totalorder %v2602_v34, %v220_v28  ;;  %v487_v36 = vmul.f32 %v2691_v31, %v457_v33 }
  0x9e   :  { %309 = vmatpush.bf16.msra.mxu1 %v301_v38 }
  0x9f   :  { %vm224_vm4 = vcmp.lt.s32.totalorder %v2602_v34, %v223_v29  ;;  %v462_v34 = vpop.permute.xlu1 %461 }
  0xa0   :  { %vm225_vm5 = vmand %vm221_vm1, %vm224_vm4  ;;  %v488_v45 = vmul.f32 %v2691_v31, %v462_v34  ;;  %v482_v34 = vpop.permute.xlu2 %481 }
  0xa1   :  { %v2686_v30 = vsel %vm225_vm5, 1.0, %v2501_v39 }
  0xa2   :  { %310 = vmatpush.bf16.msra.mxu1 %v287_v42  ;;  %2185 = vmatpush.msk.msrb.mxu2 %vm554_vm7, %v2686_v30  ;;  %v472_v1 = vpop.permute.xlu0 %471 }
  0xa3   :  { %v490_v9 = vmul.f32 %v2691_v31, %v472_v1 }
  0xa5   :  { %2170 = vmatmul.msk.bf16.vlgmr.msra.gmra.mxu1 %vm289_vm6, %v2610_v44 }
  0xa7   :  { %v477_v26 = vpop.permute.xlu1 %476 }
  0xb5   :  { %2171 = vmatmul.msk.bf16.gmra.mxu1 %vm289_vm6, %v2618_v49 }
  0xc5   :  { %2172 = vmatmul.msk.bf16.gmra.mxu1 %vm289_vm6, %v2626_v53 }
 0x10e   :  { %v354_v56 = vpop.f32.mrf.mxu2 }
 0x116   :  { %v357_v57 = vpop.f32.mrf.mxu2 }
 0x117   :  { %v363_v3 = vpack.c.bf16 %v357_v57, %v354_v56  ;;  %v489_v57 = vmul.f32 %v2691_v31, %v467_v51 }
 0x11e   :  { %v360_v58 = vpop.f32.mrf.mxu2 }
 0x11f   :  { %v364_v59 = vpack.c.bf16 %v360_v58, %v360_v58 }
 0x121   :  { %v428_v62 = vsel %vm299_vm3, %v364_v59, 0 }
 0x122   :  { %v2636_v63 = vpop.f32.mrf.mxu1  ;;  %436 = vmatpush.bf16.msrb.mxu0 %v428_v62 }
 0x123   :  { %2176 = vmatmul.msk.f32.vlgmr.msra.gmra.mxu3 %vm327_vm2, %v2636_v63 }
 0x126   :  { %437 = vmatpush.bf16.msrb.mxu0 %v363_v3 }
 0x129   :  { %2182 = vmatmul.msk.bf16.vlgmr.msrb.gmra.mxu0 %vm289_vm6, %v2642_v4 }
 0x12a   :  { %v2646_v5 = vpop.f32.mrf.mxu1 }
 0x12b   :  { %2177 = vmatmul.msk.f32.gmra.mxu3 %vm327_vm2, %v2646_v5 }
 0x132   :  { %v2652_v8 = vpop.f32.mrf.mxu1 }
 0x133   :  { %2178 = vmatmul.msk.f32.gmra.mxu3 %vm327_vm2, %v2652_v8 }
 0x139   :  { %2183 = vmatmul.msk.bf16.gmra.mxu0 %vm289_vm6, %v2658_v11 }
 0x13a   :  { %v2662_v12 = vpop.f32.mrf.mxu1 }
 0x13b   :  { %2179 = vmatmul.msk.f32.gmra.mxu3 %vm327_vm2, %v2662_v12 }
 0x142   :  { %v2668_v15 = vpop.f32.mrf.mxu1 }
 0x143   :  { %2180 = vmatmul.msk.f32.gmra.mxu3 %vm327_vm2, %v2668_v15 }
 0x149   :  { %2184 = vmatmul.msk.bf16.gmra.mxu0 %vm289_vm6, %v2674_v24 }
 0x14a   :  { %v2678_v25 = vpop.f32.mrf.mxu1 }
 0x14b   :  { %2181 = vmatmul.msk.f32.gmra.mxu3 %vm327_vm2, %v2678_v25 }
 0x1a6   :  { %v400_v35 = vpop.f32.mrf.mxu3  ;;  %v439_v32 = vpop.f32.mrf.mxu0 }
 0x1a7   :  { %v440_v37 = vadd.f32 %v439_v32, %v400_v35  ;;  %v491_v35 = vmul.f32 %v2691_v31, %v477_v26 }
 0x1a9   :  { %v493_v38 = vadd.f32 %v487_v36, %v440_v37 }
 0x1ab   :  { %vm499_vm8 = vcmp.gt.f32.partialorder %v493_v38, 0.0  ;;  %v505_v40 = vmul.f32 0.2, %v493_v38 }
 0x1ad   :  { %v511_v41 = vsel %vm499_vm8, %v493_v38, %v505_v40 }
 0x1ae   :  { %v517_v42 = vsub.f32 0.0, %v511_v41  ;;  %v403_v39 = vpop.f32.mrf.mxu3  ;;  %v441_v43 = vpop.f32.mrf.mxu0 }
 0x1af   :  { %v442_v46 = vadd.f32 %v441_v43, %v403_v39 }
 0x1b0   :  { %v523_v47 = vmul.f32 1.442695, %v517_v42 }
 0x1b1   :  { %v494_v48 = vadd.f32 %v488_v45, %v442_v46  ;;  %v492_v45 = vmul.f32 %v2691_v31, %v482_v34 }
 0x1b2   :  { %2394 = vpow2.f32 %v523_v47 }
 0x1b3   :  { %vm500_vm9 = vcmp.gt.f32.partialorder %v494_v48, 0.0  ;;  %v506_v50 = vmul.f32 0.2, %v494_v48 }
 0x1b5   :  { %v512_v52 = vsel %vm500_vm9, %v494_v48, %v506_v50 }
 0x1b6   :  { %v518_v54 = vsub.f32 0.0, %v512_v52  ;;  %v406_v55 = vpop.f32.mrf.mxu3  ;;  %v444_v56 = vpop.f32.mrf.mxu0 }
 0x1b7   :  { %v445_v58 = vadd.f32 %v444_v56, %v406_v55 }
 0x1b8   :  { %v2696_v59 = vpop.eup %2394  ;;  %v525_v60 = vmul.f32 1.442695, %v518_v54 }
 0x1b9   :  { %v495_v61 = vadd.f32 %v489_v57, %v445_v58  ;;  %2186 = vmatmul.msk.f32.vlgmr.msrb.gmra.mxu2 %vm535_vm10, %v2696_v59 }
 0x1ba   :  { %2396 = vpow2.f32 %v525_v60 }
 0x1bb   :  { %vm501_vm11 = vcmp.gt.f32.partialorder %v495_v61, 0.0  ;;  %v507_v62 = vmul.f32 0.2, %v495_v61 }
 0x1bd   :  { %v513_v2 = vsel %vm501_vm11, %v495_v61, %v507_v62  ;;  %vm798_vm11 = vcmask 523264  }
 0x1be   :  { %v519_v3 = vsub.f32 0.0, %v513_v2  ;;  %v409_v6 = vpop.f32.mrf.mxu3  ;;  %v446_v7 = vpop.f32.mrf.mxu0 }
 0x1bf   :  { %v447_v10 = vadd.f32 %v446_v7, %v409_v6 }
 0x1c0   :  { %v2701_v13 = vpop.eup %2396  ;;  %v527_v14 = vmul.f32 1.442695, %v519_v3 }
 0x1c1   :  { %v496_v16 = vadd.f32 %v490_v9, %v447_v10  ;;  %2187 = vmatmul.msk.f32.gmra.mxu2 %vm535_vm10, %v2701_v13 }
 0x1c2   :  { %2398 = vpow2.f32 %v527_v14 }
 0x1c3   :  { %vm502_vm12 = vcmp.gt.f32.partialorder %v496_v16, 0.0  ;;  %v508_v17 = vmul.f32 0.2, %v496_v16 }
 0x1c5   :  { %v514_v27 = vsel %vm502_vm12, %v496_v16, %v508_v17 }
 0x1c6   :  { %v520_v28 = vsub.f32 0.0, %v514_v27  ;;  %v412_v29 = vpop.f32.mrf.mxu3  ;;  %v449_v33 = vpop.f32.mrf.mxu0 }
 0x1c7   :  { %v450_v32 = vadd.f32 %v449_v33, %v412_v29 }
 0x1c8   :  { %v2706_v36 = vpop.eup %2398  ;;  %v529_v37 = vmul.f32 1.442695, %v520_v28 }
 0x1c9   :  { %v497_v38 = vadd.f32 %v491_v35, %v450_v32  ;;  %2188 = vmatmul.msk.f32.gmra.mxu2 %vm535_vm10, %v2706_v36 }
 0x1ca   :  { %2400 = vpow2.f32 %v529_v37 }
 0x1cb   :  { %vm503_vm13 = vcmp.gt.f32.partialorder %v497_v38, 0.0  ;;  %v509_v40 = vmul.f32 0.2, %v497_v38 }
 0x1cd   :  { %v515_v41 = vsel %vm503_vm13, %v497_v38, %v509_v40 }
 0x1ce   :  { %v521_v42 = vsub.f32 0.0, %v515_v41  ;;  %v415_v39 = vpop.f32.mrf.mxu3  ;;  %v451_v43 = vpop.f32.mrf.mxu0 }
 0x1cf   :  { %v452_v46 = vadd.f32 %v451_v43, %v415_v39  ;;  %v1081_v43 = vsel %vm535_vm10, %v2706_v36, 0.0 }
 0x1d0   :  { %v2711_v47 = vpop.eup %2400  ;;  %v531_v48 = vmul.f32 1.442695, %v521_v42 }
 0x1d1   :  { %v498_v50 = vadd.f32 %v492_v45, %v452_v46  ;;  %2189 = vmatmul.msk.f32.gmra.mxu2 %vm535_vm10, %v2711_v47 }
 0x1d2   :  { %2402 = vpow2.f32 %v531_v48 }
 0x1d3   :  { %vm504_vm14 = vcmp.gt.f32.partialorder %v498_v50, 0.0  ;;  %v510_v51 = vmul.f32 0.2, %v498_v50 }
 0x1d5   :  { %v516_v52 = vsel %vm504_vm14, %v498_v50, %v510_v51 }
 0x1d6   :  { %v522_v54 = vsub.f32 0.0, %v516_v52 }
 0x1d8   :  { %v2715_v55 = vpop.eup %2402  ;;  %v533_v56 = vmul.f32 1.442695, %v522_v54 }
 0x1d9   :  { %2190 = vmatmul.msk.f32.gmra.mxu2 %vm535_vm10, %v2715_v55 }
 0x1da   :  { %2404 = vpow2.f32 %v533_v56 }
 0x1e0   :  { %v2719_v31 = vpop.eup %2404 }
 0x1e1   :  { %2191 = vmatmul.msk.f32.gmra.mxu2 %vm535_vm10, %v2719_v31 }
 0x23c   :  { %v575_v57 = vpop.f32.mrf.mxu2 }
 0x23d   :  { %v593_v34 = vmul.f32 %v575_v57, %v2636_v63  ;;  %v67_v63 = vstv %s2142_s20 }
 0x23e   :  { %68 = vst [vmem:[#allocation3] sm:$0x1] %v67_v63 }
 0x244   :  { %v578_v58 = vpop.f32.mrf.mxu2 }
 0x245   :  { %v2327_v60 = vpack.i.bf16 %v578_v58, %v575_v57  ;;  %v594_v41 = vmul.f32 %v578_v58, %v2646_v5 }
 0x247   :  { %2328 = vrot.lane.b32.xlu2 %v2327_v60, %s2503_s12  ;;  %v716_v60 = vld [vmem:[%s2131_s25 + $0x8] sm:$0xff] }
 0x248   :  { %757 = vmatpush.msrb.mxu1 %v716_v60  ;;  %v726_v60 = vld [vmem:[%s2133_s3 + $0x8] sm:$0xff] }
 0x24c   :  { %v581_v61 = vpop.f32.mrf.mxu2 }
 0x24d   :  { %v595_v29 = vmul.f32 %v581_v61, %v2652_v8 }
 0x254   :  { %v584_v62 = vpop.f32.mrf.mxu2 }
 0x255   :  { %v2322_v1 = vpack.i.bf16 %v584_v62, %v581_v61  ;;  %v596_v33 = vmul.f32 %v584_v62, %v2662_v12  ;;  %v715_v61 = vld [vmem:[%s2131_s25] sm:$0xff] }
 0x256   :  { %758 = vmatpush.msrb.mxu1 %v715_v61  ;;  %v725_v61 = vld [vmem:[%s2133_s3] sm:$0xff] }
 0x257   :  { %2323 = vrot.lane.b32.xlu1 %v2322_v1, %s2503_s12 }
 0x25c   :  { %v587_v2 = vpop.f32.mrf.mxu2 }
 0x25d   :  { %v597_v9 = vmul.f32 %v587_v2, %v2668_v15 }
 0x264   :  { %v590_v3 = vpop.f32.mrf.mxu2 }
 0x265   :  { %v2332_v6 = vpack.i.bf16 %v590_v3, %v587_v2  ;;  %v598_v10 = vmul.f32 %v590_v3, %v2678_v25 }
 0x267   :  { %2333 = vrot.lane.b32.xlu0 %v2332_v6, %s2503_s12  ;;  %v724_v6 = vld [vmem:[%s2768_s29 + $0x38] sm:$0xff] }
 0x268   :  { %816 = vmatpush.msra.mxu2 %v724_v6 }
 0x289   :  { %632 = vxpose.xlu0.c.b16.start [1/3] (short) (narrow) %v2642_v4, 32 }
 0x299   :  { %633 = vxpose.xlu0.c.b16.cont [2/3] (short) (narrow) %v2658_v11, 32 }
 0x2a1   :  { %v2329_v28 = vpop.permute.xlu2 %2328 }
 0x2a2   :  { %v2331_v38 = vunpack.i.h.bf16 %v2329_v28  ;;  %v2330_v40 = vunpack.i.l.bf16 %v2329_v28  ;;  %v719_v28 = vld [vmem:[%s2768_s29 + $0x10] sm:$0xff] }
 0x2a4   :  { %v623_v8 = vsel %vm327_vm2, %v593_v34, %v2330_v40  ;;  %v624_v12 = vsel %vm327_vm2, %v594_v41, %v2331_v38 }
 0x2a5   :  { %v629_v39 = vpack.c.bf16 %v624_v12, %v623_v8 }
 0x2a9   :  { %634 = vxpose.xlu0.c.b16.end [3/3] (short) (narrow) %v2674_v24, 32 }
 0x2c9   :  { %v2324_v7 = vpop.permute.xlu1 %2323 }
 0x2ca   :  { %v2326_v16 = vunpack.i.h.bf16 %v2324_v7  ;;  %v2325_v17 = vunpack.i.l.bf16 %v2324_v7  ;;  %v723_v7 = vld [vmem:[%s2768_s29 + $0x30] sm:$0xff] }
 0x2cb   :  { %817 = vmatpush.msra.mxu2 %v723_v7 }
 0x2cc   :  { %v625_v15 = vsel %vm327_vm2, %v595_v29, %v2325_v17  ;;  %v626_v25 = vsel %vm327_vm2, %v596_v33, %v2326_v16  ;;  %v721_v17 = vld [vmem:[%s2768_s29 + $0x20] sm:$0xff]  ;;  %v718_v29 = vld [vmem:[%s2768_s29 + $0x8] sm:$0xff] }
 0x2cd   :  { %v630_v42 = vpack.c.bf16 %v626_v25, %v625_v15 }
 0x2d9   :  { %v2334_v14 = vpop.permute.xlu0 %2333 }
 0x2da   :  { %v2336_v26 = vunpack.i.h.bf16 %v2334_v14  ;;  %v2335_v27 = vunpack.i.l.bf16 %v2334_v14  ;;  %v722_v14 = vld [vmem:[%s2768_s29 + $0x28] sm:$0xff] }
 0x2db   :  { %818 = vmatpush.msra.mxu2 %v722_v14 }
 0x2dc   :  { %v627_v35 = vsel %vm327_vm2, %v597_v9, %v2335_v27  ;;  %v628_v32 = vsel %vm327_vm2, %v598_v10, %v2336_v26  ;;  %v720_v27 = vld [vmem:[%s2768_s29 + $0x18] sm:$0xff] }
 0x2dd   :  { %v631_v37 = vpack.c.bf16 %v628_v32, %v627_v35  ;;  %819 = vmatpush.msra.mxu2 %v721_v17 }
 0x2df   :  { %660 = vmatpush.bf16.msrb.mxu3 %v631_v37  ;;  %820 = vmatpush.msra.mxu2 %v720_v27 }
 0x2e1   :  { %821 = vmatpush.msra.mxu2 %v719_v28  ;;  %v2387_v28 = vld [vmem:[#allocation2] ss:$0 sm:$0xff] }
 0x2e3   :  { %661 = vmatpush.bf16.msrb.mxu3 %v630_v42  ;;  %822 = vmatpush.msra.mxu2 %v718_v29  ;;  %v919_v29 = vmul.f32 %v2387_v28, %v2577_v18  ;;  %v921_v18 = vmul.f32 %v2387_v28, %v2581_v20 }
 0x2e7   :  { %662 = vmatpush.bf16.msrb.mxu3 %v629_v39  ;;  %v717_v39 = vld [vmem:[%s2768_s29] sm:$0xff] }
 0x2e8   :  { %823 = vmatpush.msra.mxu2 %v717_v39 }
 0x31a   :  { %1082 = vadd.xlane.f32.xlu0 %v1081_v43 }
 0x335   :  { %v2751_v5 = vpop.trf.xlu0 }
 0x336   :  { %2192 = vmatmul.msk.bf16.vlgmr.msrb.gmra.mxu3 %vm648_vm15, %v2751_v5 }
 0x345   :  { %v2755_v45 = vpop.trf.xlu0 }
 0x346   :  { %2193 = vmatmul.msk.bf16.gmra.mxu3 %vm648_vm15, %v2755_v45 }
 0x3b9   :  { %v664_v36 = vpop.f32.mrf.mxu3 }
 0x3ba   :  { %vm673_vm0 = vcmp.gt.f32.partialorder %v664_v36, 0.0 }
 0x3bb   :  { %v676_v46 = vsel %vm673_vm0, %v664_v36, 1.0 }
 0x3bc   :  { %2406 = vrcp.f32 %v676_v46 }
 0x3c1   :  { %v666_v48 = vpop.f32.mrf.mxu3 }
 0x3c2   :  { %v2407_v50 = vpop.eup %2406  ;;  %vm674_vm1 = vcmp.gt.f32.partialorder %v666_v48, 0.0 }
 0x3c3   :  { %v677_v51 = vsel %vm674_vm1, %v666_v48, 1.0  ;;  %685 = vrot.lane.b32.xlu1 %v2407_v50, %s2506_s21 }
 0x3c4   :  { %2408 = vrcp.f32 %v677_v51  ;;  %v732_v51 = vld [vmem:[%s2133_s3 + $0x38] sm:$0xff] }
 0x3c5   :  { %862 = vmatpush.msra.mxu1 %v732_v51 }
 0x3c9   :  { %v669_v52 = vpop.f32.mrf.mxu3 }
 0x3ca   :  { %v2409_v54 = vpop.eup %2408  ;;  %vm675_vm4 = vcmp.gt.f32.partialorder %v669_v52, 0.0 }
 0x3cb   :  { %v678_v56 = vsel %vm675_vm4, %v669_v52, 1.0  ;;  %687 = vrot.lane.b32.xlu2 %v2409_v54, %s2506_s21  ;;  %v730_v54 = vld [vmem:[%s2133_s3 + $0x28] sm:$0xff] }
 0x3cc   :  { %2410 = vrcp.f32 %v678_v56  ;;  %v729_v56 = vld [vmem:[%s2133_s3 + $0x20] sm:$0xff] }
 0x3d1   :  { %v671_v57 = vpop.f32.mrf.mxu3 }
 0x3d2   :  { %v2411_v58 = vpop.eup %2410  ;;  %v728_v57 = vld [vmem:[%s2133_s3 + $0x18] sm:$0xff] }
 0x3d3   :  { %689 = vrot.lane.b32.xlu1 %v2411_v58, %s2506_s21  ;;  %v727_v58 = vld [vmem:[%s2133_s3 + $0x10] sm:$0xff] }
 0x425   :  { %v688_v62 = vpop.permute.xlu2 %687 }
 0x426   :  { %v695_v1 = vmul.f32 %v688_v62, %v666_v48 }
 0x428   :  { %v701_v9 = vmin.f32 %v695_v1, 0.0  ;;  %vm698_vm8 = vcmp.gt.f32.partialorder %v695_v1, 0.0 }
 0x42a   :  { %v705_v26 = vmul.f32 1.442695, %v701_v9 }
 0x435   :  { %v686_v2 = vpop.permute.xlu1 %685 }
 0x436   :  { %v694_v3 = vmul.f32 %v686_v2, %v664_v36 }
 0x438   :  { %v700_v10 = vmin.f32 %v694_v3, 0.0  ;;  %vm697_vm5 = vcmp.gt.f32.partialorder %v694_v3, 0.0 }
 0x43a   :  { %v703_v16 = vmul.f32 1.442695, %v700_v10 }
 0x43c   :  { %2412 = vpow2.f32 %v703_v16 }
 0x43d   :  { %2414 = vpow2.f32 %v705_v26 }
 0x442   :  { %v2413_v33 = vpop.eup %2412 }
 0x443   :  { %v2194_v35 = vadd.f32 -1.0, %v2413_v33  ;;  %v2415_v38 = vpop.eup %2414 }
 0x444   :  { %v2195_v25 = vadd.f32 -1.0, %v2415_v38 }
 0x445   :  { %v690_v32 = vpop.permute.xlu1 %689  ;;  %v712_v37 = vsel %vm697_vm5, %v694_v3, %v2194_v35 }
 0x446   :  { %v696_v40 = vmul.f32 %v690_v32, %v669_v52  ;;  %2197 = vmatmul.msk.f32.vlgmr.msrb.gmra.mxu1 %vm327_vm2, %v712_v37  ;;  %v713_v41 = vsel %vm698_vm8, %v695_v1, %v2195_v25  ;;  %v731_v52 = vld [vmem:[%s2133_s3 + $0x30] sm:$0xff] }
 0x447   :  { %863 = vmatpush.msra.mxu1 %v731_v52 }
 0x448   :  { %v702_v15 = vmin.f32 %v696_v40, 0.0  ;;  %vm699_vm9 = vcmp.gt.f32.partialorder %v696_v40, 0.0 }
 0x449   :  { %864 = vmatpush.msra.mxu1 %v730_v54  ;;  %v922_v54 = vmul.f32 %v2387_v28, %v2586_v21 }
 0x44a   :  { %v707_v34 = vmul.f32 1.442695, %v702_v15 }
 0x44b   :  { %865 = vmatpush.msra.mxu1 %v729_v56 }
 0x44c   :  { %2416 = vpow2.f32 %v707_v34 }
 0x44d   :  { %866 = vmatpush.msra.mxu1 %v728_v57 }
 0x44e   :  { %2198 = vmatmul.msk.f32.gmra.mxu1 %vm327_vm2, %v713_v41 }
 0x44f   :  { %867 = vmatpush.msra.mxu1 %v727_v58 }
 0x451   :  { %868 = vmatpush.msra.mxu1 %v726_v60 }
 0x452   :  { %v2417_v42 = vpop.eup %2416 }
 0x453   :  { %v2196_v8 = vadd.f32 -1.0, %v2417_v42  ;;  %869 = vmatpush.msra.mxu1 %v725_v61 }
 0x455   :  { %v714_v12 = vsel %vm699_vm9, %v696_v40, %v2196_v8  ;;  %v920_v40 = vmul.f32 %v2387_v28, %v2579_v19 }
 0x456   :  { %2199 = vmatmul.msk.f32.gmra.mxu1 %vm327_vm2, %v714_v12 }
 0x4c3   :  { %v760_v43 = vpop.f32.mrf.mxu1 }
 0x4c4   :  { %2203 = vmatmul.msk.f32.vlgmr.msra.gmra.mxu2 %vm798_vm11, %v760_v43 }
 0x4cb   :  { %v763_v63 = vpop.f32.mrf.mxu1 }
 0x4cc   :  { %2204 = vmatmul.msk.f32.gmra.mxu2 %vm798_vm11, %v763_v63  ;;  %v769_v50 = vpack.c.bf16 %v763_v63, %v760_v43 }
 0x4d3   :  { %v766_v36 = vpop.f32.mrf.mxu1 }
 0x4d4   :  { %v770_v46 = vpack.c.bf16 %v766_v36, %v766_v36  ;;  %2205 = vmatmul.msk.f32.gmra.mxu2 %vm798_vm11, %v766_v36 }
 0x4d6   :  { %v772_v48 = vsel %vm299_vm3, %v770_v46, 0 }
 0x4d7   :  { %780 = vmatpush.bf16.msra.mxu0 %v772_v48 }
 0x4db   :  { %781 = vmatpush.bf16.msra.mxu0 %v769_v50 }
 0x4de   :  { %2200 = vmatmul.msk.bf16.vlgmr.msra.gmra.mxu0 %vm289_vm6, %v2610_v44 }
 0x4ee   :  { %2201 = vmatmul.msk.bf16.gmra.mxu0 %vm289_vm6, %v2618_v49 }
 0x4fe   :  { %2202 = vmatmul.msk.bf16.gmra.mxu0 %vm289_vm6, %v2626_v53 }
 0x547   :  { %v825_v62 = vpop.f32.mrf.mxu2 }
 0x54f   :  { %v828_v1 = vpop.f32.mrf.mxu2 }
 0x550   :  { %v834_v9 = vpack.c.bf16 %v828_v1, %v825_v62 }
 0x557   :  { %v831_v2 = vpop.f32.mrf.mxu2 }
 0x558   :  { %v835_v3 = vpack.c.bf16 %v831_v2, %v831_v2 }
 0x55a   :  { %v890_v6 = vsel %vm299_vm3, %v835_v3, 0 }
 0x55b   :  { %v2795_v7 = vpop.f32.mrf.mxu0  ;;  %898 = vmatpush.bf16.msra.mxu3 %v890_v6  ;;  %v923_v6 = vmul.f32 %v2387_v28, %v2588_v22 }
 0x55c   :  { %2206 = vmatmul.msk.f32.vlgmr.msra.gmra.mxu1 %vm798_vm11, %v2795_v7 }
 0x55f   :  { %899 = vmatpush.bf16.msra.mxu3 %v834_v9 }
 0x562   :  { %2212 = vmatmul.msk.bf16.vlgmr.msra.gmra.mxu3 %vm289_vm6, %v2642_v4 }
 0x563   :  { %v2801_v10 = vpop.f32.mrf.mxu0 }
 0x564   :  { %2207 = vmatmul.msk.f32.gmra.mxu1 %vm798_vm11, %v2801_v10 }
 0x56b   :  { %v2805_v14 = vpop.f32.mrf.mxu0 }
 0x56c   :  { %2208 = vmatmul.msk.f32.gmra.mxu1 %vm798_vm11, %v2805_v14 }
 0x572   :  { %2213 = vmatmul.msk.bf16.gmra.mxu3 %vm289_vm6, %v2658_v11 }
 0x573   :  { %v2811_v16 = vpop.f32.mrf.mxu0 }
 0x574   :  { %2209 = vmatmul.msk.f32.gmra.mxu1 %vm798_vm11, %v2811_v16 }
 0x57b   :  { %v2815_v17 = vpop.f32.mrf.mxu0 }
 0x57c   :  { %2210 = vmatmul.msk.f32.gmra.mxu1 %vm798_vm11, %v2815_v17 }
 0x582   :  { %2214 = vmatmul.msk.bf16.gmra.mxu3 %vm289_vm6, %v2674_v24 }
 0x583   :  { %v2821_v26 = vpop.f32.mrf.mxu0 }
 0x584   :  { %2211 = vmatmul.msk.f32.gmra.mxu1 %vm798_vm11, %v2821_v26 }
 0x5d9   :  { %v871_v27 = vpop.f32.mrf.mxu1 }
 0x5e1   :  { %v874_v33 = vpop.f32.mrf.mxu1 }
 0x5e5   :  { %v901_v35 = vpop.f32.mrf.mxu3 }
 0x5e6   :  { %v902_v32 = vadd.f32 %v901_v35, %v871_v27 }
 0x5e8   :  { %v925_v37 = vadd.f32 %v919_v29, %v902_v32 }
 0x5e9   :  { %v877_v8 = vpop.f32.mrf.mxu1 }
 0x5ea   :  { %vm931_vm12 = vcmp.gt.f32.partialorder %v925_v37, 0.0  ;;  %v937_v38 = vmul.f32 0.2, %v925_v37 }
 0x5ec   :  { %v943_v15 = vsel %vm931_vm12, %v925_v37, %v937_v38  ;;  %v924_v38 = vmul.f32 %v2387_v28, %v2590_v23 }
 0x5ed   :  { %v949_v25 = vsub.f32 0.0, %v943_v15  ;;  %v903_v34 = vpop.f32.mrf.mxu3 }
 0x5ee   :  { %v904_v41 = vadd.f32 %v903_v34, %v874_v33 }
 0x5ef   :  { %v955_v42 = vmul.f32 1.442695, %v949_v25 }
 0x5f0   :  { %v926_v12 = vadd.f32 %v920_v40, %v904_v41 }
 0x5f1   :  { %2418 = vpow2.f32 %v955_v42  ;;  %v880_v19 = vpop.f32.mrf.mxu1 }
 0x5f2   :  { %vm932_vm13 = vcmp.gt.f32.partialorder %v926_v12, 0.0  ;;  %v938_v39 = vmul.f32 0.2, %v926_v12 }
 0x5f4   :  { %v944_v43 = vsel %vm932_vm13, %v926_v12, %v938_v39 }
 0x5f5   :  { %v950_v63 = vsub.f32 0.0, %v944_v43  ;;  %v906_v36 = vpop.f32.mrf.mxu3 }
 0x5f6   :  { %v907_v46 = vadd.f32 %v906_v36, %v877_v8 }
 0x5f7   :  { %v2419_v48 = vpop.eup %2418  ;;  %v957_v50 = vmul.f32 1.442695, %v950_v63 }
 0x5f8   :  { %v927_v51 = vadd.f32 %v921_v18, %v907_v46  ;;  %969 = vperm.xlu2 %2321, %v2419_v48  }
 0x5f9   :  { %2420 = vpow2.f32 %v957_v50  ;;  %v883_v3 = vpop.f32.mrf.mxu1 }
 0x5fa   :  { %vm933_vm14 = vcmp.gt.f32.partialorder %v927_v51, 0.0  ;;  %v939_v52 = vmul.f32 0.2, %v927_v51 }
 0x5fc   :  { %v945_v56 = vsel %vm933_vm14, %v927_v51, %v939_v52 }
 0x5fd   :  { %v951_v57 = vsub.f32 0.0, %v945_v56  ;;  %v908_v58 = vpop.f32.mrf.mxu3 }
 0x5fe   :  { %v909_v60 = vadd.f32 %v908_v58, %v880_v19 }
 0x5ff   :  { %v2421_v61 = vpop.eup %2420  ;;  %v959_v20 = vmul.f32 1.442695, %v951_v57 }
 0x600   :  { %v928_v62 = vadd.f32 %v922_v54, %v909_v60  ;;  %v2347_v1 = vpack.i.bf16 %v2421_v61, %v2419_v48 }
 0x601   :  { %2422 = vpow2.f32 %v959_v20  ;;  %v886_v15 = vpop.f32.mrf.mxu1 }
 0x602   :  { %vm934_vm0 = vcmp.gt.f32.partialorder %v928_v62, 0.0  ;;  %v940_v2 = vmul.f32 0.2, %v928_v62 }
 0x604   :  { %v946_v9 = vsel %vm934_vm0, %v928_v62, %v940_v2 }
 0x605   :  { %v952_v27 = vsub.f32 0.0, %v946_v9  ;;  %v911_v29 = vpop.f32.mrf.mxu3 }
 0x606   :  { %v912_v33 = vadd.f32 %v911_v29, %v883_v3 }
 0x607   :  { %v2423_v35 = vpop.eup %2422  ;;  %v961_v21 = vmul.f32 1.442695, %v952_v27 }
 0x608   :  { %v929_v32 = vadd.f32 %v923_v6, %v912_v33  ;;  %979 = vperm.xlu1 %2320, %v2423_v35  }
 0x609   :  { %2424 = vpow2.f32 %v961_v21 }
 0x60a   :  { %vm935_vm1 = vcmp.gt.f32.partialorder %v929_v32, 0.0  ;;  %v941_v37 = vmul.f32 0.2, %v929_v32 }
 0x60c   :  { %v947_v40 = vsel %vm935_vm1, %v929_v32, %v941_v37 }
 0x60d   :  { %v953_v25 = vsub.f32 0.0, %v947_v40  ;;  %v913_v34 = vpop.f32.mrf.mxu3 }
 0x60e   :  { %v914_v41 = vadd.f32 %v913_v34, %v886_v15 }
 0x60f   :  { %v2425_v42 = vpop.eup %2424  ;;  %v963_v22 = vmul.f32 1.442695, %v953_v25 }
 0x610   :  { %v930_v8 = vadd.f32 %v924_v38, %v914_v41  ;;  %984 = vperm.xlu2 %2321, %v2425_v42   ;;  %v2337_v12 = vpack.i.bf16 %v2425_v42, %v2423_v35  ;;  %v2511_v38 = vmov 64  }
 0x611   :  { %2426 = vpow2.f32 %v963_v22  ;;  %v1075_v22 = vsel %vm535_vm10, %v2696_v59, 0.0  ;;  %v1090_v59 = vsel %vm535_vm10, %v2719_v31, 0.0 }
 0x612   :  { %vm936_vm4 = vcmp.gt.f32.partialorder %v930_v8, 0.0  ;;  %v942_v39 = vmul.f32 0.2, %v930_v8  ;;  %2338 = vrot.lane.b32.xlu1 %v2337_v12, %s2510_s4  ;;  %v1078_v12 = vsel %vm535_vm10, %v2701_v13, 0.0  ;;  %v1110_v13 = vld [vmem:[%s2135_s8 + $0x20] sm:$0xff] }
 0x614   :  { %v948_v18 = vsel %vm936_vm4, %v930_v8, %v942_v39  ;;  %v1084_v8 = vsel %vm535_vm10, %v2711_v47, 0.0  ;;  %v1113_v39 = vld [vmem:[%s2135_s8 + $0x38] sm:$0xff]  ;;  %v1112_v47 = vld [vmem:[%s2135_s8 + $0x30] sm:$0xff] }
 0x615   :  { %v954_v43 = vsub.f32 0.0, %v948_v18  ;;  %1136 = vmatpush.msrb.mxu0 %v1113_v39  ;;  %v1111_v18 = vld [vmem:[%s2135_s8 + $0x28] sm:$0xff] }
 0x617   :  { %v2427_v63 = vpop.eup %2426  ;;  %v965_v23 = vmul.f32 1.442695, %v954_v43  ;;  %1137 = vmatpush.msrb.mxu0 %v1112_v47  ;;  %v1109_v43 = vld [vmem:[%s2135_s8 + $0x18] sm:$0xff] }
 0x618   :  { %989 = vperm.xlu2 %2321, %v2427_v63  }
 0x619   :  { %2428 = vpow2.f32 %v965_v23  ;;  %1138 = vmatpush.msrb.mxu0 %v1111_v18  ;;  %v1107_v23 = vld [vmem:[%s2135_s8 + $0x8] sm:$0xff] }
 0x61b   :  { %1139 = vmatpush.msrb.mxu0 %v1110_v13  ;;  %v1083_v13 = vpop.xlane.xlu0 %1082 }
 0x61d   :  { %1140 = vmatpush.msrb.mxu0 %v1109_v43 }
 0x61f   :  { %v2429_v28 = vpop.eup %2428 }
 0x620   :  { %994 = vperm.xlu1 %2320, %v2429_v28   ;;  %v2342_v36 = vpack.i.bf16 %v2429_v28, %v2427_v63  ;;  %2353 = vset.pattern.permute.xlu2 %v2511_v38  ;;  %v1108_v63 = vld [vmem:[%s2135_s8 + $0x10] sm:$0xff] }
 0x621   :  { %1141 = vmatpush.msrb.mxu0 %v1108_v63 }
 0x622   :  { %2343 = vrot.lane.b32.xlu2 %v2342_v36, %s2510_s4 }
 0x623   :  { %1142 = vmatpush.msrb.mxu0 %v1107_v23 }
 0x628   :  { %974 = vperm.xlu1 %2320, %v2421_v61  }
 0x62a   :  { %2348 = vrot.lane.b32.xlu2 %v2347_v1, %s2510_s4 }
 0x630   :  { %2352 = vset.pattern.permute.xlu1 %v2511_v38 }
 0x652   :  { %v970_v46 = vpop.permute.xlu2 %969 }
 0x66a   :  { %v985_v48 = vpop.permute.xlu2 %984 }
 0x66b   :  { %v1000_v2 = vmul.f32 %v985_v48, %v2811_v16 }
 0x672   :  { %v990_v51 = vpop.permute.xlu2 %989 }
 0x673   :  { %v1001_v56 = vmul.f32 %v990_v51, %v2815_v17  ;;  %v1115_v51 = vld [vmem:[%s2136_s13 + $0x8] sm:$0xff] }
 0x67a   :  { %v980_v50 = vpop.permute.xlu1 %979 }
 0x67b   :  { %v999_v61 = vmul.f32 %v980_v50, %v2805_v14 }
 0x67c   :  { %v2344_v52 = vpop.permute.xlu2 %2343 }
 0x67d   :  { %v2345_v54 = vunpack.i.l.bf16 %v2344_v52  ;;  %v2346_v58 = vunpack.i.h.bf16 %v2344_v52 }
 0x67f   :  { %v1025_v1 = vsel %vm798_vm11, %v1001_v56, %v2345_v54 }
 0x684   :  { %v2339_v19 = vpop.permute.xlu1 %2338  ;;  %v2349_v6 = vpop.permute.xlu2 %2348 }
 0x685   :  { %v2341_v60 = vunpack.i.h.bf16 %v2339_v19  ;;  %v2340_v20 = vunpack.i.l.bf16 %v2339_v19  ;;  %v2350_v29 = vunpack.i.l.bf16 %v2349_v6  ;;  %v2351_v21 = vunpack.i.h.bf16 %v2349_v6  ;;  %v1114_v19 = vld [vmem:[%s2136_s13] sm:$0xff] }
 0x687   :  { %v1023_v27 = vsel %vm798_vm11, %v999_v61, %v2340_v20  ;;  %v1024_v17 = vsel %vm798_vm11, %v1000_v2, %v2341_v60  ;;  %v1116_v20 = vld [vmem:[%s2137_s18] sm:$0xff] }
 0x688   :  { %v1028_v35 = vpack.c.bf16 %v1024_v17, %v1023_v27 }
 0x692   :  { %v995_v57 = vpop.permute.xlu1 %994 }
 0x693   :  { %v1002_v62 = vmul.f32 %v995_v57, %v2821_v26  ;;  %v997_v26 = vmul.f32 %v970_v46, %v2795_v7 }
 0x695   :  { %v1026_v3 = vsel %vm798_vm11, %v1002_v62, %v2346_v58  ;;  %v1021_v14 = vsel %vm798_vm11, %v997_v26, %v2350_v29  ;;  %v2515_v26 = vmov 2.0  }
 0x696   :  { %v1029_v9 = vpack.c.bf16 %v1026_v3, %v1025_v1 }
 0x698   :  { %1035 = vmatpush.bf16.msrb.mxu2 %v1029_v9 }
 0x69a   :  { %v975_v33 = vpop.permute.xlu1 %974 }
 0x69b   :  { %v998_v16 = vmul.f32 %v975_v33, %v2801_v10 }
 0x69c   :  { %1036 = vmatpush.bf16.msrb.mxu2 %v1028_v35 }
 0x69d   :  { %v1022_v32 = vsel %vm798_vm11, %v998_v16, %v2351_v21 }
 0x69e   :  { %v1027_v37 = vpack.c.bf16 %v1022_v32, %v1021_v14 }
 0x6a0   :  { %1037 = vmatpush.bf16.msrb.mxu2 %v1027_v37 }
 0x6a3   :  { %2215 = vmatmul.msk.bf16.vlgmr.msrb.gmra.mxu2 %vm648_vm15, %v2751_v5 }
 0x6a4   :  { %1206 = vmatpush.msra.mxu2 %v1115_v51 }
 0x6a6   :  { %1207 = vmatpush.msra.mxu2 %v1114_v19 }
 0x6a8   :  { %2235 = vmatpush.msk.msrb.mxu2 %vm554_vm7, %v2686_v30  ;;  %v1117_v30 = vld [vmem:[%s2137_s18 + $0x8] sm:$0xff] }
 0x6a9   :  { %1252 = vmatpush.msrb.mxu3 %v1117_v30 }
 0x6ab   :  { %1253 = vmatpush.msrb.mxu3 %v1116_v20 }
 0x6b3   :  { %2216 = vmatmul.msk.bf16.gmra.mxu2 %vm648_vm15, %v2755_v45 }
 0x726   :  { %v1039_v7 = vpop.f32.mrf.mxu2 }
 0x727   :  { %vm1048_vm5 = vcmp.gt.f32.partialorder %v1039_v7, 0.0 }
 0x728   :  { %v1051_v10 = vsel %vm1048_vm5, %v1039_v7, 1.0 }
 0x729   :  { %2430 = vrcp.f32 %v1051_v10 }
 0x72e   :  { %v1041_v40 = vpop.f32.mrf.mxu2 }
 0x72f   :  { %v2431_v15 = vpop.eup %2430  ;;  %vm1049_vm8 = vcmp.gt.f32.partialorder %v1041_v40, 0.0 }
 0x730   :  { %v1052_v25 = vsel %vm1049_vm8, %v1041_v40, 1.0  ;;  %1059 = vperm.xlu1 %2352, %v2431_v15   ;;  %v2924_v15 = vld [vmem:[%s2732_s16] ss:$0 sm:$0xff]  ;;  %s2516_s16 = smov 14  }
 0x731   :  { %2432 = vrcp.f32 %v1052_v25  ;;  %s2139_s22 = sld [smem:[%s3185_s0 + %s2516_s16]]  }
 0x732   :  { %s2152_s16 = sld [smem:[%s3185_s0 + %s2522_s15]]  }
 0x736   :  { %v1044_v34 = vpop.f32.mrf.mxu2 }
 0x737   :  { %v2433_v5 = vpop.eup %2432  ;;  %vm1050_vm9 = vcmp.gt.f32.partialorder %v1044_v34, 0.0 }
 0x738   :  { %v1053_v41 = vsel %vm1050_vm9, %v1044_v34, 1.0  ;;  %1064 = vperm.xlu2 %2353, %v2433_v5  }
 0x739   :  { %2434 = vrcp.f32 %v1053_v41 }
 0x73a   :  { %2436 = vrcp.f32 %v2515_v26 }
 0x73e   :  { %v1046_v45 = vpop.f32.mrf.mxu2 }
 0x73f   :  { %v2435_v42 = vpop.eup %2434 }
 0x740   :  { %1069 = vperm.xlu1 %2352, %v2435_v42   ;;  %2369 = vset.pattern.permute.xlu2 %v2492_v0  ;;  %v1087_v0 = vsel %vm535_vm10, %v2715_v55, 0.0  ;;  %v1106_v55 = vld [vmem:[%s2135_s8] sm:$0xff]  ;;  %v2437_v21 = vpop.eup %2436 }
 0x741   :  { %1143 = vmatpush.msrb.mxu0 %v1106_v55  ;;  %v1094_v16 = vmul.f32 2.0, %v2437_v21  ;;  %vm1098_vm7 = vweird.f32 %v2437_v21 }
 0x743   :  { %v1095_v14 = vsub.f32 1.0, %v1094_v16 }
 0x745   :  { %v1096_v32 = vmul.f32 %v2437_v21, %v1095_v14 }
 0x747   :  { %v1097_v37 = vadd.f32 %v2437_v21, %v1096_v32 }
 0x749   :  { %v2918_v10 = vsel %vm1098_vm7, %v2437_v21, %v1097_v37 }
 0x74a   :  { %v2934_v23 = vmul.f32 %v2918_v10, %v1083_v13 }
 0x761   :  { %1076 = vadd.xlane.f32.xlu2 %v1075_v22 }
 0x769   :  { %1085 = vadd.xlane.f32.xlu2 %v1084_v8 }
 0x76a   :  { %1079 = vadd.xlane.f32.xlu1 %v1078_v12 }
 0x771   :  { %1088 = vadd.xlane.f32.xlu2 %v1087_v0 }
 0x772   :  { %1091 = vadd.xlane.f32.xlu1 %v1090_v59 }
 0x792   :  { %v1065_v31 = vpop.permute.xlu2 %1064 }
 0x793   :  { %v1073_v46 = vmul.f32 %v1065_v31, %v1041_v40 }
 0x7a2   :  { %v1060_v28 = vpop.permute.xlu1 %1059 }
 0x7a3   :  { %v1072_v36 = vmul.f32 %v1060_v28, %v1039_v7 }
 0x7a5   :  { %2217 = vmatmul.msk.f32.vlgmr.msrb.gmra.mxu0 %vm798_vm11, %v1072_v36 }
 0x7ad   :  { %2218 = vmatmul.msk.f32.gmra.mxu0 %vm798_vm11, %v1073_v46 }
 0x7b2   :  { %v1070_v48 = vpop.permute.xlu1 %1069 }
 0x7b3   :  { %v1074_v50 = vmul.f32 %v1070_v48, %v1044_v34 }
 0x7b5   :  { %2219 = vmatmul.msk.f32.gmra.mxu0 %vm798_vm11, %v1074_v50  ;;  %v1305_v50 = vmul.f32 %v2924_v15, %v2934_v23 }
 0x7d4   :  { %v1077_v7 = vpop.xlane.xlu2 %1076 }
 0x7d5   :  { %v2921_v40 = vmul.f32 %v2918_v10, %v1077_v7 }
 0x7d7   :  { %v1303_v5 = vmul.f32 %v2924_v15, %v2921_v40 }
 0x7dc   :  { %v1086_v28 = vpop.xlane.xlu2 %1085 }
 0x7dd   :  { %v1080_v45 = vpop.xlane.xlu1 %1079 }
 0x7de   :  { %v2929_v22 = vmul.f32 %v2918_v10, %v1080_v45 }
 0x7e0   :  { %v1304_v47 = vmul.f32 %v2924_v15, %v2929_v22 }
 0x822   :  { %v1145_v52 = vpop.f32.mrf.mxu0 }
 0x823   :  { %2223 = vmatmul.msk.f32.vlgmr.msra.gmra.mxu2 %vm327_vm2, %v1145_v52 }
 0x82a   :  { %v1148_v54 = vpop.f32.mrf.mxu0 }
 0x82b   :  { %2224 = vmatmul.msk.f32.gmra.mxu2 %vm327_vm2, %v1148_v54  ;;  %v1154_v60 = vpack.c.bf16 %v1148_v54, %v1145_v52 }
 0x832   :  { %v1151_v56 = vpop.f32.mrf.mxu0 }
 0x833   :  { %v1155_v57 = vpack.c.bf16 %v1151_v56, %v1151_v56  ;;  %2225 = vmatmul.msk.f32.gmra.mxu2 %vm327_vm2, %v1151_v56  ;;  %v2943_v56 = vmul.f32 %v2918_v10, %v1086_v28 }
 0x835   :  { %v1157_v58 = vsel %vm299_vm3, %v1155_v57, 0 }
 0x836   :  { %1165 = vmatpush.bf16.msrb.mxu1 %v1157_v58 }
 0x83a   :  { %1166 = vmatpush.bf16.msrb.mxu1 %v1154_v60 }
 0x83d   :  { %2220 = vmatmul.msk.bf16.vlgmr.msrb.gmra.mxu1 %vm289_vm6, %v2642_v4 }
 0x84d   :  { %2221 = vmatmul.msk.bf16.gmra.mxu1 %vm289_vm6, %v2658_v11 }
 0x85d   :  { %2222 = vmatmul.msk.bf16.gmra.mxu1 %vm289_vm6, %v2674_v24 }
 0x8a6   :  { %v1209_v62 = vpop.f32.mrf.mxu2 }
 0x8ae   :  { %v1212_v2 = vpop.f32.mrf.mxu2 }
 0x8af   :  { %v1218_v9 = vpack.c.bf16 %v1212_v2, %v1209_v62  ;;  %v1306_v62 = vmul.f32 %v2924_v15, %v2943_v56 }
 0x8b6   :  { %v1215_v61 = vpop.f32.mrf.mxu2 }
 0x8b7   :  { %v1219_v1 = vpack.c.bf16 %v1215_v61, %v1215_v61 }
 0x8b9   :  { %v1274_v3 = vsel %vm299_vm3, %v1219_v1, 0  ;;  %v1089_v1 = vpop.xlane.xlu2 %1088 }
 0x8ba   :  { %v2888_v6 = vpop.f32.mrf.mxu1  ;;  %1282 = vmatpush.bf16.msra.mxu0 %v1274_v3  ;;  %v2952_v26 = vmul.f32 %v2918_v10, %v1089_v1 }
 0x8bb   :  { %2226 = vmatmul.msk.f32.vlgmr.msrb.gmra.mxu3 %vm327_vm2, %v2888_v6 }
 0x8bc   :  { %v1307_v7 = vmul.f32 %v2924_v15, %v2952_v26 }
 0x8be   :  { %1283 = vmatpush.bf16.msra.mxu0 %v1218_v9 }
 0x8c1   :  { %2232 = vmatmul.msk.bf16.vlgmr.msra.gmra.mxu0 %vm289_vm6, %v2610_v44 }
 0x8c2   :  { %v2894_v27 = vpop.f32.mrf.mxu1 }
 0x8c3   :  { %2227 = vmatmul.msk.f32.gmra.mxu3 %vm327_vm2, %v2894_v27 }
 0x8ca   :  { %v2898_v17 = vpop.f32.mrf.mxu1 }
 0x8cb   :  { %2228 = vmatmul.msk.f32.gmra.mxu3 %vm327_vm2, %v2898_v17 }
 0x8d1   :  { %2233 = vmatmul.msk.bf16.gmra.mxu0 %vm289_vm6, %v2618_v49 }
 0x8d2   :  { %v2904_v29 = vpop.f32.mrf.mxu1 }
 0x8d3   :  { %2229 = vmatmul.msk.f32.gmra.mxu3 %vm327_vm2, %v2904_v29 }
 0x8da   :  { %v2908_v33 = vpop.f32.mrf.mxu1 }
 0x8db   :  { %2230 = vmatmul.msk.f32.gmra.mxu3 %vm327_vm2, %v2908_v33 }
 0x8e1   :  { %2234 = vmatmul.msk.bf16.gmra.mxu0 %vm289_vm6, %v2626_v53 }
 0x8e2   :  { %v2914_v35 = vpop.f32.mrf.mxu1 }
 0x8e3   :  { %2231 = vmatmul.msk.f32.gmra.mxu3 %vm327_vm2, %v2914_v35 }
 0x93e   :  { %v1255_v25 = vpop.f32.mrf.mxu3  ;;  %v1285_v34 = vpop.f32.mrf.mxu0 }
 0x93f   :  { %v1286_v41 = vadd.f32 %v1285_v34, %v1255_v25 }
 0x941   :  { %v1309_v42 = vadd.f32 %v1303_v5, %v1286_v41  ;;  %v1092_v5 = vpop.xlane.xlu1 %1091 }
 0x943   :  { %vm1315_vm12 = vcmp.gt.f32.partialorder %v1309_v42, 0.0  ;;  %v1321_v8 = vmul.f32 0.2, %v1309_v42 }
 0x945   :  { %v1327_v12 = vsel %vm1315_vm12, %v1309_v42, %v1321_v8  ;;  %v2961_v42 = vmul.f32 %v2918_v10, %v1092_v5 }
 0x946   :  { %v1333_v0 = vsub.f32 0.0, %v1327_v12  ;;  %v1258_v59 = vpop.f32.mrf.mxu3  ;;  %v1287_v39 = vpop.f32.mrf.mxu0 }
 0x947   :  { %v1288_v18 = vadd.f32 %v1287_v39, %v1258_v59 }
 0x948   :  { %v1339_v43 = vmul.f32 1.442695, %v1333_v0 }
 0x949   :  { %v1310_v63 = vadd.f32 %v1304_v47, %v1288_v18  ;;  %v1308_v47 = vmul.f32 %v2924_v15, %v2961_v42 }
 0x94a   :  { %2438 = vpow2.f32 %v1339_v43 }
 0x94b   :  { %vm1316_vm13 = vcmp.gt.f32.partialorder %v1310_v63, 0.0  ;;  %v1322_v55 = vmul.f32 0.2, %v1310_v63 }
 0x94d   :  { %v1328_v36 = vsel %vm1316_vm13, %v1310_v63, %v1322_v55 }
 0x94e   :  { %v1334_v31 = vsub.f32 0.0, %v1328_v36  ;;  %v1261_v46 = vpop.f32.mrf.mxu3  ;;  %v1290_v48 = vpop.f32.mrf.mxu0 }
 0x94f   :  { %v1291_v51 = vadd.f32 %v1290_v48, %v1261_v46 }
 0x950   :  { %v2938_v19 = vpop.eup %2438  ;;  %v1341_v52 = vmul.f32 1.442695, %v1334_v31 }
 0x951   :  { %v1311_v54 = vadd.f32 %v1305_v50, %v1291_v51  ;;  %2236 = vmatmul.msk.f32.vlgmr.msrb.gmra.mxu2 %vm535_vm10, %v2938_v19 }
 0x952   :  { %2440 = vpow2.f32 %v1341_v52 }
 0x953   :  { %vm1317_vm14 = vcmp.gt.f32.partialorder %v1311_v54, 0.0  ;;  %v1323_v57 = vmul.f32 0.2, %v1311_v54 }
 0x955   :  { %v1329_v58 = vsel %vm1317_vm14, %v1311_v54, %v1323_v57 }
 0x956   :  { %v1335_v60 = vsub.f32 0.0, %v1329_v58  ;;  %v1264_v30 = vpop.f32.mrf.mxu3  ;;  %v1292_v20 = vpop.f32.mrf.mxu0 }
 0x957   :  { %v1293_v2 = vadd.f32 %v1292_v20, %v1264_v30 }
 0x958   :  { %v2947_v61 = vpop.eup %2440  ;;  %v1343_v3 = vmul.f32 1.442695, %v1335_v60 }
 0x959   :  { %v1312_v9 = vadd.f32 %v1306_v62, %v1293_v2  ;;  %2237 = vmatmul.msk.f32.gmra.mxu2 %vm535_vm10, %v2947_v61 }
 0x95a   :  { %2442 = vpow2.f32 %v1343_v3 }
 0x95b   :  { %vm1318_vm0 = vcmp.gt.f32.partialorder %v1312_v9, 0.0  ;;  %v1324_v21 = vmul.f32 0.2, %v1312_v9 }
 0x95d   :  { %v1330_v16 = vsel %vm1318_vm0, %v1312_v9, %v1324_v21 }
 0x95e   :  { %v1336_v14 = vsub.f32 0.0, %v1330_v16  ;;  %v1267_v32 = vpop.f32.mrf.mxu3  ;;  %v1295_v37 = vpop.f32.mrf.mxu0 }
 0x95f   :  { %v1296_v25 = vadd.f32 %v1295_v37, %v1267_v32 }
 0x960   :  { %v2956_v34 = vpop.eup %2442  ;;  %v1345_v41 = vmul.f32 1.442695, %v1336_v14 }
 0x961   :  { %v1313_v45 = vadd.f32 %v1307_v7, %v1296_v25  ;;  %2238 = vmatmul.msk.f32.gmra.mxu2 %vm535_vm10, %v2956_v34 }
 0x962   :  { %2444 = vpow2.f32 %v1345_v41 }
 0x963   :  { %vm1319_vm1 = vcmp.gt.f32.partialorder %v1313_v45, 0.0  ;;  %v1325_v8 = vmul.f32 0.2, %v1313_v45 }
 0x965   :  { %v1331_v12 = vsel %vm1319_vm1, %v1313_v45, %v1325_v8 }
 0x966   :  { %v1337_v0 = vsub.f32 0.0, %v1331_v12  ;;  %v1270_v59 = vpop.f32.mrf.mxu3  ;;  %v1297_v39 = vpop.f32.mrf.mxu0 }
 0x967   :  { %v1298_v18 = vadd.f32 %v1297_v39, %v1270_v59 }
 0x968   :  { %v2965_v13 = vpop.eup %2444  ;;  %v1347_v43 = vmul.f32 1.442695, %v1337_v0 }
 0x969   :  { %v1314_v63 = vadd.f32 %v1308_v47, %v1298_v18  ;;  %2239 = vmatmul.msk.f32.gmra.mxu2 %vm535_vm10, %v2965_v13 }
 0x96a   :  { %2446 = vpow2.f32 %v1347_v43 }
 0x96b   :  { %vm1320_vm4 = vcmp.gt.f32.partialorder %v1314_v63, 0.0  ;;  %v1326_v55 = vmul.f32 0.2, %v1314_v63 }
 0x96d   :  { %v1332_v28 = vsel %vm1320_vm4, %v1314_v63, %v1326_v55 }
 0x96e   :  { %v1338_v36 = vsub.f32 0.0, %v1332_v28 }
 0x970   :  { %v2969_v31 = vpop.eup %2446  ;;  %v1349_v46 = vmul.f32 1.442695, %v1338_v36 }
 0x971   :  { %2240 = vmatmul.msk.f32.gmra.mxu2 %vm535_vm10, %v2969_v31 }
 0x972   :  { %2448 = vpow2.f32 %v1349_v46 }
 0x978   :  { %v2973_v15 = vpop.eup %2448 }
 0x979   :  { %2241 = vmatmul.msk.f32.gmra.mxu2 %vm535_vm10, %v2973_v15 }
 0x9d4   :  { %v1386_v48 = vpop.f32.mrf.mxu2 }
 0x9d5   :  { %v1404_v14 = vmul.f32 %v1386_v48, %v2888_v6 }
 0x9dc   :  { %v1389_v50 = vpop.f32.mrf.mxu2 }
 0x9dd   :  { %v2364_v30 = vpack.i.bf16 %v1389_v50, %v1386_v48  ;;  %v1405_v32 = vmul.f32 %v1389_v50, %v2894_v27  ;;  %v1526_v50 = vld [vmem:[%s2139_s22 + $0x8] sm:$0xff] }
 0x9de   :  { %1567 = vmatpush.msrb.mxu0 %v1526_v50  ;;  %2276 = vmatpush.msra.mxu3 %v1526_v50 }
 0x9e4   :  { %v1392_v51 = vpop.f32.mrf.mxu2 }
 0x9e5   :  { %v1406_v37 = vmul.f32 %v1392_v51, %v2898_v17 }
 0x9ec   :  { %v1395_v52 = vpop.f32.mrf.mxu2 }
 0x9ed   :  { %v2354_v54 = vpack.i.bf16 %v1395_v52, %v1392_v51  ;;  %v1407_v7 = vmul.f32 %v1395_v52, %v2904_v29  ;;  %v1525_v51 = vld [vmem:[%s2139_s22] sm:$0xff] }
 0x9ee   :  { %1568 = vmatpush.msrb.mxu0 %v1525_v51  ;;  %2277 = vmatpush.msra.mxu3 %v1525_v51 }
 0x9ef   :  { %2355 = vrot.lane.b32.xlu1 %v2354_v54, %s2503_s12 }
 0x9f4   :  { %v1398_v57 = vpop.f32.mrf.mxu2 }
 0x9f5   :  { %v1408_v62 = vmul.f32 %v1398_v57, %v2908_v33 }
 0x9fc   :  { %v1401_v58 = vpop.f32.mrf.mxu2 }
 0x9fd   :  { %v2359_v60 = vpack.i.bf16 %v1401_v58, %v1398_v57  ;;  %v1409_v2 = vmul.f32 %v1401_v58, %v2914_v35  ;;  %v1534_v57 = vld [vmem:[%s3012_s26 + $0x38] sm:$0xff]  ;;  %v1533_v58 = vld [vmem:[%s3012_s26 + $0x30] sm:$0xff] }
 0x9fe   :  { %1625 = vmatpush.msra.mxu2 %v1534_v57 }
 0x9ff   :  { %2360 = vrot.lane.b32.xlu2 %v2359_v60, %s2503_s12 }
 0xa00   :  { %1626 = vmatpush.msra.mxu2 %v1533_v58 }
 0xa07   :  { %2365 = vrot.lane.b32.xlu2 %v2364_v30, %s2503_s12  ;;  %v1532_v30 = vld [vmem:[%s3012_s26 + $0x28] sm:$0xff]  ;;  %s2518_s12 = smov 19  }
 0xa08   :  { %1627 = vmatpush.msra.mxu2 %v1532_v30  ;;  %s3110_s1 = sld [smem:[%s3185_s0 + %s2518_s12]]  }
 0xa24   :  { %1443 = vxpose.xlu1.c.b16.start [1/3] (short) (narrow) %v2610_v44, 32 }
 0xa34   :  { %1444 = vxpose.xlu1.c.b16.cont [2/3] (short) (narrow) %v2618_v49, 32 }
 0xa44   :  { %1445 = vxpose.xlu1.c.b16.end [3/3] (short) (narrow) %v2626_v53, 32 }
 0xa59   :  { %v2361_v20 = vpop.permute.xlu2 %2360 }
 0xa5a   :  { %v2363_v1 = vunpack.i.h.bf16 %v2361_v20  ;;  %v2362_v3 = vunpack.i.l.bf16 %v2361_v20 }
 0xa5c   :  { %v1438_v9 = vsel %vm327_vm2, %v1408_v62, %v2362_v3  ;;  %v1439_v21 = vsel %vm327_vm2, %v1409_v2, %v2363_v1  ;;  %v1531_v62 = vld [vmem:[%s3012_s26 + $0x20] sm:$0xff]  ;;  %v1530_v2 = vld [vmem:[%s3012_s26 + $0x18] sm:$0xff] }
 0xa5d   :  { %v1442_v16 = vpack.c.bf16 %v1439_v21, %v1438_v9  ;;  %1628 = vmatpush.msra.mxu2 %v1531_v62  ;;  %v1529_v9 = vld [vmem:[%s3012_s26 + $0x10] sm:$0xff] }
 0xa5f   :  { %1470 = vmatpush.bf16.msra.mxu1 %v1442_v16  ;;  %1629 = vmatpush.msra.mxu2 %v1530_v2  ;;  %v1528_v16 = vld [vmem:[%s3012_s26 + $0x8] sm:$0xff] }
 0xa61   :  { %v2356_v25 = vpop.permute.xlu1 %2355  ;;  %v2366_v33 = vpop.permute.xlu2 %2365  ;;  %1630 = vmatpush.msra.mxu2 %v1529_v9 }
 0xa62   :  { %v2358_v5 = vunpack.i.h.bf16 %v2356_v25  ;;  %v2357_v35 = vunpack.i.l.bf16 %v2356_v25  ;;  %v2368_v41 = vunpack.i.h.bf16 %v2366_v33  ;;  %v2367_v45 = vunpack.i.l.bf16 %v2366_v33 }
 0xa63   :  { %1631 = vmatpush.msra.mxu2 %v1528_v16 }
 0xa64   :  { %v1436_v8 = vsel %vm327_vm2, %v1406_v37, %v2357_v35  ;;  %v1437_v12 = vsel %vm327_vm2, %v1407_v7, %v2358_v5  ;;  %v1434_v0 = vsel %vm327_vm2, %v1404_v14, %v2367_v45  ;;  %v1435_v6 = vsel %vm327_vm2, %v1405_v32, %v2368_v41 }
 0xa65   :  { %v1441_v59 = vpack.c.bf16 %v1437_v12, %v1436_v8  ;;  %v1440_v27 = vpack.c.bf16 %v1435_v6, %v1434_v0 }
 0xa67   :  { %1471 = vmatpush.bf16.msra.mxu1 %v1441_v59  ;;  %v1527_v59 = vld [vmem:[%s3012_s26] sm:$0xff] }
 0xa68   :  { %1632 = vmatpush.msra.mxu2 %v1527_v59 }
 0xa6b   :  { %1472 = vmatpush.bf16.msra.mxu1 %v1440_v27 }
 0xad0   :  { %v2995_v17 = vpop.trf.xlu1 }
 0xad1   :  { %2242 = vmatmul.msk.bf16.vlgmr.msra.gmra.mxu1 %vm648_vm15, %v2995_v17 }
 0xae0   :  { %v2999_v29 = vpop.trf.xlu1 }
 0xae1   :  { %2243 = vmatmul.msk.bf16.gmra.mxu1 %vm648_vm15, %v2999_v29 }
 0xb4e   :  { %v1474_v39 = vpop.f32.mrf.mxu1 }
 0xb4f   :  { %vm1483_vm5 = vcmp.gt.f32.partialorder %v1474_v39, 0.0 }
 0xb50   :  { %v1486_v47 = vsel %vm1483_vm5, %v1474_v39, 1.0 }
 0xb51   :  { %2450 = vrcp.f32 %v1486_v47 }
 0xb56   :  { %v1476_v18 = vpop.f32.mrf.mxu1 }
 0xb57   :  { %v2451_v43 = vpop.eup %2450  ;;  %vm1484_vm8 = vcmp.gt.f32.partialorder %v1476_v18, 0.0 }
 0xb58   :  { %v1487_v63 = vsel %vm1484_vm8, %v1476_v18, 1.0  ;;  %1495 = vrot.lane.b32.xlu2 %v2451_v43, %s2506_s21 }
 0xb59   :  { %2452 = vrcp.f32 %v1487_v63 }
 0xb5e   :  { %v1479_v55 = vpop.f32.mrf.mxu1 }
 0xb5f   :  { %v2453_v28 = vpop.eup %2452  ;;  %vm1485_vm9 = vcmp.gt.f32.partialorder %v1479_v55, 0.0 }
 0xb60   :  { %v1488_v36 = vsel %vm1485_vm9, %v1479_v55, 1.0  ;;  %1497 = vrot.lane.b32.xlu2 %v2453_v28, %s2506_s21  ;;  %v1541_v28 = vld [vmem:[%s2141_s28 + $0x30] sm:$0xff] }
 0xb61   :  { %2454 = vrcp.f32 %v1488_v36  ;;  %v1540_v36 = vld [vmem:[%s2141_s28 + $0x28] sm:$0xff] }
 0xb66   :  { %v1481_v46 = vpop.f32.mrf.mxu1 }
 0xb67   :  { %v2455_v48 = vpop.eup %2454  ;;  %v1539_v46 = vld [vmem:[%s2141_s28 + $0x20] sm:$0xff] }
 0xb68   :  { %1499 = vrot.lane.b32.xlu2 %v2455_v48, %s2506_s21  ;;  %v1538_v48 = vld [vmem:[%s2141_s28 + $0x18] sm:$0xff]  ;;  %s3177_s21 = sld [smem:[%s3185_s0 + %s2524_s24]]  }
 0xbb2   :  { %v1496_v52 = vpop.permute.xlu2 %1495 }
 0xbb3   :  { %v1504_v54 = vmul.f32 %v1496_v52, %v1474_v39 }
 0xbb5   :  { %v1510_v60 = vmin.f32 %v1504_v54, 0.0  ;;  %vm1507_vm7 = vcmp.gt.f32.partialorder %v1504_v54, 0.0 }
 0xbb7   :  { %v1513_v20 = vmul.f32 1.442695, %v1510_v60 }
 0xbb9   :  { %2456 = vpow2.f32 %v1513_v20 }
 0xbba   :  { %v1498_v1 = vpop.permute.xlu2 %1497 }
 0xbbb   :  { %v1505_v3 = vmul.f32 %v1498_v1, %v1476_v18  ;;  %v2391_v1 = vld [vmem:[#allocation3] ss:$0 sm:$0xff] }
 0xbbc   :  { %v1728_v9 = vmul.f32 %v2391_v1, %v2921_v40  ;;  %v1730_v40 = vmul.f32 %v2391_v1, %v2934_v23 }
 0xbbd   :  { %v1511_v21 = vmin.f32 %v1505_v3, 0.0  ;;  %vm1508_vm12 = vcmp.gt.f32.partialorder %v1505_v3, 0.0 }
 0xbbf   :  { %v2457_v14 = vpop.eup %2456  ;;  %v1515_v32 = vmul.f32 1.442695, %v1511_v21 }
 0xbc0   :  { %v2244_v37 = vadd.f32 -1.0, %v2457_v14 }
 0xbc1   :  { %2458 = vpow2.f32 %v1515_v32 }
 0xbc2   :  { %v1522_v7 = vsel %vm1507_vm7, %v1504_v54, %v2244_v37  ;;  %v1500_v25 = vpop.permute.xlu2 %1499 }
 0xbc3   :  { %v1506_v33 = vmul.f32 %v1500_v25, %v1479_v55  ;;  %2247 = vmatmul.msk.f32.vlgmr.msrb.gmra.mxu0 %vm327_vm2, %v1522_v7  ;;  %v1542_v55 = vld [vmem:[%s2141_s28 + $0x38] sm:$0xff]  ;;  %v1729_v25 = vmul.f32 %v2391_v1, %v2929_v22 }
 0xbc4   :  { %1671 = vmatpush.msrb.mxu3 %v1542_v55  ;;  %v1731_v55 = vmul.f32 %v2391_v1, %v2943_v56 }
 0xbc5   :  { %v1512_v5 = vmin.f32 %v1506_v33, 0.0  ;;  %vm1509_vm13 = vcmp.gt.f32.partialorder %v1506_v33, 0.0 }
 0xbc6   :  { %1672 = vmatpush.msrb.mxu3 %v1541_v28 }
 0xbc7   :  { %v2459_v35 = vpop.eup %2458  ;;  %v1517_v41 = vmul.f32 1.442695, %v1512_v5 }
 0xbc8   :  { %v2245_v45 = vadd.f32 -1.0, %v2459_v35  ;;  %1673 = vmatpush.msrb.mxu3 %v1540_v36 }
 0xbc9   :  { %2460 = vpow2.f32 %v1517_v41 }
 0xbca   :  { %v1523_v8 = vsel %vm1508_vm12, %v1505_v3, %v2245_v45  ;;  %1674 = vmatpush.msrb.mxu3 %v1539_v46 }
 0xbcb   :  { %2248 = vmatmul.msk.f32.vlgmr.msra.gmra.mxu3 %vm327_vm2, %v1523_v8 }
 0xbcc   :  { %1675 = vmatpush.msrb.mxu3 %v1538_v48 }
 0xbcf   :  { %v2461_v12 = vpop.eup %2460 }
 0xbd0   :  { %v2246_v0 = vadd.f32 -1.0, %v2461_v12 }
 0xbd2   :  { %v1524_v6 = vsel %vm1509_vm13, %v1506_v33, %v2246_v0 }
 0xbd3   :  { %2249 = vmatmul.msk.f32.gmra.mxu3 %vm327_vm2, %v1524_v6 }
 0xc40   :  { %v1570_v27 = vpop.f32.mrf.mxu0 }
 0xc41   :  { %2253 = vmatmul.msk.f32.vlgmr.msra.gmra.mxu2 %vm798_vm11, %v1570_v27 }
 0xc4e   :  { %v1573_v39 = vpop.f32.mrf.mxu3 }
 0xc4f   :  { %2254 = vmatmul.msk.f32.gmra.mxu2 %vm798_vm11, %v1573_v39  ;;  %v1579_v63 = vpack.c.bf16 %v1573_v39, %v1570_v27 }
 0xc56   :  { %v1576_v47 = vpop.f32.mrf.mxu3 }
 0xc57   :  { %v1580_v18 = vpack.c.bf16 %v1576_v47, %v1576_v47  ;;  %2255 = vmatmul.msk.f32.gmra.mxu2 %vm798_vm11, %v1576_v47 }
 0xc59   :  { %v1582_v43 = vsel %vm299_vm3, %v1580_v18, 0 }
 0xc5a   :  { %1590 = vmatpush.bf16.msra.mxu0 %v1582_v43 }
 0xc5e   :  { %1591 = vmatpush.bf16.msra.mxu0 %v1579_v63 }
 0xc61   :  { %2250 = vmatmul.msk.bf16.vlgmr.msra.gmra.mxu0 %vm289_vm6, %v2642_v4  ;;  %v1537_v4 = vld [vmem:[%s2141_s28 + $0x10] sm:$0xff] }
 0xc62   :  { %1676 = vmatpush.msrb.mxu3 %v1537_v4 }
 0xc71   :  { %2251 = vmatmul.msk.bf16.gmra.mxu0 %vm289_vm6, %v2658_v11  ;;  %v1536_v11 = vld [vmem:[%s2141_s28 + $0x8] sm:$0xff] }
 0xc72   :  { %1677 = vmatpush.msrb.mxu3 %v1536_v11 }
 0xc81   :  { %2252 = vmatmul.msk.bf16.gmra.mxu0 %vm289_vm6, %v2674_v24  ;;  %v1535_v24 = vld [vmem:[%s2141_s28] sm:$0xff] }
 0xc82   :  { %1678 = vmatpush.msrb.mxu3 %v1535_v24 }
 0xcc4   :  { %v1634_v50 = vpop.f32.mrf.mxu2 }
 0xcd2   :  { %v1637_v51 = vpop.f32.mrf.mxu2 }
 0xcd3   :  { %v1643_v60 = vpack.c.bf16 %v1637_v51, %v1634_v50 }
 0xcda   :  { %v1640_v52 = vpop.f32.mrf.mxu2 }
 0xcdb   :  { %v1644_v54 = vpack.c.bf16 %v1640_v52, %v1640_v52  ;;  %v1732_v52 = vmul.f32 %v2391_v1, %v2952_v26 }
 0xcdd   :  { %v1699_v57 = vsel %vm299_vm3, %v1644_v54, 0 }
 0xcde   :  { %v3040_v58 = vpop.f32.mrf.mxu0  ;;  %1707 = vmatpush.bf16.msrb.mxu1 %v1699_v57 }
 0xcdf   :  { %2256 = vmatmul.msk.f32.vlgmr.msrb.gmra.mxu3 %vm798_vm11, %v3040_v58 }
 0xce2   :  { %1708 = vmatpush.bf16.msrb.mxu1 %v1643_v60 }
 0xce5   :  { %2262 = vmatmul.msk.bf16.vlgmr.msrb.gmra.mxu1 %vm289_vm6, %v2610_v44 }
 0xce6   :  { %v3046_v30 = vpop.f32.mrf.mxu0 }
 0xce7   :  { %2257 = vmatmul.msk.f32.gmra.mxu3 %vm798_vm11, %v3046_v30 }
 0xcee   :  { %v3050_v20 = vpop.f32.mrf.mxu0 }
 0xcef   :  { %2258 = vmatmul.msk.f32.gmra.mxu3 %vm798_vm11, %v3050_v20 }
 0xcf5   :  { %2263 = vmatmul.msk.bf16.gmra.mxu1 %vm289_vm6, %v2618_v49 }
 0xcf6   :  { %v3056_v62 = vpop.f32.mrf.mxu0 }
 0xcf7   :  { %2259 = vmatmul.msk.f32.gmra.mxu3 %vm798_vm11, %v3056_v62 }
 0xcfe   :  { %v3060_v2 = vpop.f32.mrf.mxu0 }
 0xcff   :  { %2260 = vmatmul.msk.f32.gmra.mxu3 %vm798_vm11, %v3060_v2 }
 0xd05   :  { %2264 = vmatmul.msk.bf16.gmra.mxu1 %vm289_vm6, %v2626_v53 }
 0xd06   :  { %v3066_v44 = vpop.f32.mrf.mxu0 }
 0xd07   :  { %2261 = vmatmul.msk.f32.gmra.mxu3 %vm798_vm11, %v3066_v44 }
 0xd62   :  { %v1680_v49 = vpop.f32.mrf.mxu3  ;;  %v1710_v3 = vpop.f32.mrf.mxu1 }
 0xd63   :  { %v1711_v21 = vadd.f32 %v1710_v3, %v1680_v49 }
 0xd65   :  { %v1734_v16 = vadd.f32 %v1728_v9, %v1711_v21 }
 0xd67   :  { %vm1740_vm2 = vcmp.gt.f32.partialorder %v1734_v16, 0.0  ;;  %v1746_v14 = vmul.f32 0.2, %v1734_v16 }
 0xd69   :  { %v1752_v32 = vsel %vm1740_vm2, %v1734_v16, %v1746_v14  ;;  %v1733_v14 = vmul.f32 %v2391_v1, %v2961_v42 }
 0xd6a   :  { %v1683_v37 = vpop.f32.mrf.mxu3  ;;  %v1712_v7 = vpop.f32.mrf.mxu1  ;;  %v1758_v33 = vsub.f32 0.0, %v1752_v32 }
 0xd6b   :  { %v1713_v53 = vadd.f32 %v1712_v7, %v1683_v37 }
 0xd6c   :  { %v1764_v41 = vmul.f32 1.442695, %v1758_v33 }
 0xd6d   :  { %v1735_v5 = vadd.f32 %v1729_v25, %v1713_v53 }
 0xd6e   :  { %2462 = vpow2.f32 %v1764_v41 }
 0xd6f   :  { %vm1741_vm3 = vcmp.gt.f32.partialorder %v1735_v5, 0.0  ;;  %v1747_v35 = vmul.f32 0.2, %v1735_v5 }
 0xd71   :  { %v1753_v45 = vsel %vm1741_vm3, %v1735_v5, %v1747_v35 }
 0xd72   :  { %v1759_v8 = vsub.f32 0.0, %v1753_v45  ;;  %v1686_v12 = vpop.f32.mrf.mxu3  ;;  %v1715_v0 = vpop.f32.mrf.mxu1 }
 0xd73   :  { %v1716_v6 = vadd.f32 %v1715_v0, %v1686_v12 }
 0xd74   :  { %v1766_v59 = vmul.f32 1.442695, %v1759_v8  ;;  %v2463_v63 = vpop.eup %2462 }
 0xd75   :  { %v1736_v27 = vadd.f32 %v1730_v40, %v1716_v6 }
 0xd76   :  { %2464 = vpow2.f32 %v1766_v59 }
 0xd77   :  { %vm1742_vm6 = vcmp.gt.f32.partialorder %v1736_v27, 0.0  ;;  %v1748_v39 = vmul.f32 0.2, %v1736_v27 }
 0xd79   :  { %v1754_v22 = vsel %vm1742_vm6, %v1736_v27, %v1748_v39 }
 0xd7a   :  { %v1760_v47 = vsub.f32 0.0, %v1754_v22  ;;  %v1689_v18 = vpop.f32.mrf.mxu3  ;;  %v1717_v43 = vpop.f32.mrf.mxu1 }
 0xd7b   :  { %v1718_v28 = vadd.f32 %v1717_v43, %v1689_v18 }
 0xd7c   :  { %v2465_v36 = vpop.eup %2464  ;;  %v1768_v46 = vmul.f32 1.442695, %v1760_v47 }
 0xd7d   :  { %v1737_v48 = vadd.f32 %v1731_v55, %v1718_v28  ;;  %v2380_v4 = vpack.i.bf16 %v2465_v36, %v2463_v63 }
 0xd7e   :  { %2466 = vpow2.f32 %v1768_v46 }
 0xd7f   :  { %vm1743_vm14 = vcmp.gt.f32.partialorder %v1737_v48, 0.0  ;;  %v1749_v23 = vmul.f32 0.2, %v1737_v48 }
 0xd81   :  { %v1755_v11 = vsel %vm1743_vm14, %v1737_v48, %v1749_v23 }
 0xd82   :  { %v1761_v24 = vsub.f32 0.0, %v1755_v11  ;;  %v1692_v50 = vpop.f32.mrf.mxu3  ;;  %v1720_v51 = vpop.f32.mrf.mxu1 }
 0xd83   :  { %v1721_v54 = vadd.f32 %v1720_v51, %v1692_v50 }
 0xd84   :  { %v2467_v57 = vpop.eup %2466  ;;  %v1770_v60 = vmul.f32 1.442695, %v1761_v24 }
 0xd85   :  { %v1738_v49 = vadd.f32 %v1732_v52, %v1721_v54  ;;  %1788 = vperm.xlu2 %2369, %v2467_v57  }
 0xd86   :  { %2468 = vpow2.f32 %v1770_v60 }
 0xd87   :  { %vm1744_vm0 = vcmp.gt.f32.partialorder %v1738_v49, 0.0  ;;  %v1750_v56 = vmul.f32 0.2, %v1738_v49 }
 0xd89   :  { %v1756_v3 = vsel %vm1744_vm0, %v1738_v49, %v1750_v56 }
 0xd8a   :  { %v1762_v9 = vsub.f32 0.0, %v1756_v3  ;;  %v1695_v21 = vpop.f32.mrf.mxu3  ;;  %v1722_v16 = vpop.f32.mrf.mxu1 }
 0xd8b   :  { %v1723_v32 = vadd.f32 %v1722_v16, %v1695_v21  ;;  %v1893_v21 = vsel %vm535_vm10, %v2965_v13, 0.0  ;;  %v1890_v16 = vsel %vm535_vm10, %v2956_v34, 0.0  ;;  %v1914_v34 = vld [vmem:[%s2143_s5 + $0x30] sm:$0xff]  ;;  %v1913_v13 = vld [vmem:[%s2143_s5 + $0x28] sm:$0xff] }
 0xd8c   :  { %v2469_v37 = vpop.eup %2468  ;;  %v1772_v7 = vmul.f32 1.442695, %v1762_v9  ;;  %v1884_v9 = vsel %vm535_vm10, %v2938_v19, 0.0  ;;  %v1896_v19 = vsel %vm535_vm10, %v2969_v31, 0.0 }
 0xd8d   :  { %v1739_v25 = vadd.f32 %v1733_v14, %v1723_v32  ;;  %1793 = vperm.xlu2 %2369, %v2469_v37   ;;  %v2370_v26 = vpack.i.bf16 %v2469_v37, %v2467_v57  ;;  %v1899_v14 = vsel %vm535_vm10, %v2973_v15, 0.0  ;;  %v1912_v15 = vld [vmem:[%s2143_s5 + $0x20] sm:$0xff]  ;;  %v1911_v32 = vld [vmem:[%s2143_s5 + $0x18] sm:$0xff]  ;;  %v1910_v37 = vld [vmem:[%s2143_s5 + $0x10] sm:$0xff] }
 0xd8e   :  { %2470 = vpow2.f32 %v1772_v7  ;;  %v1909_v7 = vld [vmem:[%s2143_s5 + $0x8] sm:$0xff] }
 0xd8f   :  { %vm1745_vm1 = vcmp.gt.f32.partialorder %v1739_v25, 0.0  ;;  %v1751_v53 = vmul.f32 0.2, %v1739_v25  ;;  %2371 = vrot.lane.b32.xlu0 %v2370_v26, %s2510_s4 }
 0xd91   :  { %v1757_v33 = vsel %vm1745_vm1, %v1739_v25, %v1751_v53  ;;  %v1908_v25 = vld [vmem:[%s2143_s5] sm:$0xff] }
 0xd92   :  { %v1763_v5 = vsub.f32 0.0, %v1757_v33 }
 0xd94   :  { %v2471_v35 = vpop.eup %2470  ;;  %v1774_v41 = vmul.f32 1.442695, %v1763_v5 }
 0xd95   :  { %1798 = vperm.xlu2 %2369, %v2471_v35  }
 0xd96   :  { %2472 = vpow2.f32 %v1774_v41  ;;  %v1965_v41 = vld [vmem:[%s3128_s14 + $0x38] sm:$0xff] }
 0xd97   :  { %1987 = vmatpush.msra.mxu3 %v1965_v41 }
 0xd9c   :  { %v2473_v45 = vpop.eup %2472 }
 0xd9d   :  { %1803 = vperm.xlu2 %2369, %v2473_v45   ;;  %v2375_v42 = vpack.i.bf16 %v2473_v45, %v2471_v35  ;;  %v1964_v45 = vld [vmem:[%s3128_s14 + $0x30] sm:$0xff] }
 0xd9e   :  { %1988 = vmatpush.msra.mxu3 %v1964_v45 }
 0xd9f   :  { %2376 = vrot.lane.b32.xlu0 %v2375_v42, %s2510_s4  ;;  %v1963_v42 = vld [vmem:[%s3128_s14 + $0x28] sm:$0xff] }
 0xda0   :  { %1989 = vmatpush.msra.mxu3 %v1963_v42 }
 0xda5   :  { %1778 = vperm.xlu2 %2369, %v2463_v63  }
 0xda7   :  { %1783 = vperm.xlu0 %2319, %v2465_v36  }
 0xdad   :  { %2381 = vrot.lane.b32.xlu2 %v2380_v4, %s2510_s4 }
 0xdae   :  { %2386 = vset.pattern.permute.xlu2 %v2511_v38 }
 0xdaf   :  { %2385 = vset.pattern.permute.xlu0 %v2511_v38 }
 0xddf   :  { %v1789_v1 = vpop.permute.xlu2 %1788 }
 0xde0   :  { %v1808_v63 = vmul.f32 %v1789_v1, %v3050_v20  ;;  %v1962_v1 = vld [vmem:[%s3128_s14 + $0x20] sm:$0xff] }
 0xde1   :  { %1990 = vmatpush.msra.mxu3 %v1962_v1 }
 0xde7   :  { %v1794_v8 = vpop.permute.xlu2 %1793 }
 0xde8   :  { %v1809_v55 = vmul.f32 %v1794_v8, %v3056_v62 }
 0xdef   :  { %v1799_v12 = vpop.permute.xlu2 %1798 }
 0xdf0   :  { %v1810_v59 = vmul.f32 %v1799_v12, %v3060_v2  ;;  %v1961_v12 = vld [vmem:[%s3128_s14 + $0x18] sm:$0xff] }
 0xdf1   :  { %1991 = vmatpush.msra.mxu3 %v1961_v12 }
 0xdf7   :  { %v1804_v0 = vpop.permute.xlu2 %1803 }
 0xdf8   :  { %v1811_v27 = vmul.f32 %v1804_v0, %v3066_v44 }
 0xdff   :  { %v1779_v6 = vpop.permute.xlu2 %1778 }
 0xe00   :  { %v1806_v11 = vmul.f32 %v1779_v6, %v3040_v58 }
 0xe01   :  { %v2372_v40 = vpop.permute.xlu0 %2371 }
 0xe02   :  { %v2374_v22 = vunpack.i.h.bf16 %v2372_v40  ;;  %v2373_v47 = vunpack.i.l.bf16 %v2372_v40 }
 0xe04   :  { %v1832_v48 = vsel %vm798_vm11, %v1808_v63, %v2373_v47  ;;  %v1833_v2 = vsel %vm798_vm11, %v1809_v55, %v2374_v22  ;;  %v1960_v55 = vld [vmem:[%s3128_s14 + $0x10] sm:$0xff] }
 0xe05   :  { %v1837_v23 = vpack.c.bf16 %v1833_v2, %v1832_v48  ;;  %1992 = vmatpush.msra.mxu3 %v1960_v55  ;;  %v2012_v48 = vld [vmem:[%s3156_s23 + $0x20] sm:$0xff]  ;;  %v2011_v2 = vld [vmem:[%s3156_s23 + $0x18] sm:$0xff] }
 0xe07   :  { %v2382_v36 = vpop.permute.xlu2 %2381 }
 0xe08   :  { %v2383_v44 = vunpack.i.l.bf16 %v2382_v36  ;;  %v2384_v24 = vunpack.i.h.bf16 %v2382_v36  ;;  %v2014_v36 = vld [vmem:[%s3156_s23 + $0x30] sm:$0xff] }
 0xe0a   :  { %v1830_v62 = vsel %vm798_vm11, %v1806_v11, %v2383_v44  ;;  %v2392_v44 = vld [vmem:[%s3110_s1] ss:$0 sm:$0xff] }
 0xe11   :  { %v2377_v39 = vpop.permute.xlu0 %2376 }
 0xe12   :  { %v2379_v18 = vunpack.i.h.bf16 %v2377_v39  ;;  %v2378_v43 = vunpack.i.l.bf16 %v2377_v39 }
 0xe14   :  { %v1834_v38 = vsel %vm798_vm11, %v1810_v59, %v2378_v43  ;;  %v1835_v28 = vsel %vm798_vm11, %v1811_v27, %v2379_v18 }
 0xe15   :  { %v1838_v46 = vpack.c.bf16 %v1835_v28, %v1834_v38  ;;  %v1959_v38 = vld [vmem:[%s3128_s14 + $0x8] sm:$0xff]  ;;  %v1958_v28 = vld [vmem:[%s3128_s14] sm:$0xff] }
 0xe16   :  { %1993 = vmatpush.msra.mxu3 %v1959_v38 }
 0xe17   :  { %1844 = vmatpush.bf16.msrb.mxu2 %v1838_v46  ;;  %v2013_v46 = vld [vmem:[%s3156_s23 + $0x28] sm:$0xff] }
 0xe18   :  { %1994 = vmatpush.msra.mxu3 %v1958_v28 }
 0xe19   :  { %v1784_v4 = vpop.permute.xlu0 %1783 }
 0xe1a   :  { %v1807_v20 = vmul.f32 %v1784_v4, %v3046_v30 }
 0xe1b   :  { %1845 = vmatpush.bf16.msrb.mxu2 %v1837_v23 }
 0xe1c   :  { %v1831_v50 = vsel %vm798_vm11, %v1807_v20, %v2384_v24 }
 0xe1d   :  { %v1836_v51 = vpack.c.bf16 %v1831_v50, %v1830_v62 }
 0xe1f   :  { %1846 = vmatpush.bf16.msrb.mxu2 %v1836_v51 }
 0xe22   :  { %2265 = vmatmul.msk.bf16.vlgmr.msrb.gmra.mxu2 %vm648_vm15, %v2995_v17 }
 0xe32   :  { %2266 = vmatmul.msk.bf16.gmra.mxu2 %vm648_vm15, %v2999_v29  ;;  %v1887_v29 = vsel %vm535_vm10, %v2947_v61, 0.0  ;;  %v1915_v61 = vld [vmem:[%s2143_s5 + $0x38] sm:$0xff]  ;;  %vm2108_vm10 = vcmask 7168  }
 0xe33   :  { %1937 = vmatpush.msrb.mxu0 %v1915_v61 }
 0xe35   :  { %1938 = vmatpush.msrb.mxu0 %v1914_v34 }
 0xe37   :  { %1939 = vmatpush.msrb.mxu0 %v1913_v13 }
 0xe39   :  { %1940 = vmatpush.msrb.mxu0 %v1912_v15 }
 0xe3b   :  { %1941 = vmatpush.msrb.mxu0 %v1911_v32 }
 0xe3d   :  { %1942 = vmatpush.msrb.mxu0 %v1910_v37 }
 0xe3f   :  { %1943 = vmatpush.msrb.mxu0 %v1909_v7 }
 0xe41   :  { %1944 = vmatpush.msrb.mxu0 %v1908_v25 }
 0xea5   :  { %v1848_v52 = vpop.f32.mrf.mxu2 }
 0xea6   :  { %vm1857_vm4 = vcmp.gt.f32.partialorder %v1848_v52, 0.0 }
 0xea7   :  { %v1860_v54 = vsel %vm1857_vm4, %v1848_v52, 1.0 }
 0xea8   :  { %2474 = vrcp.f32 %v1860_v54  ;;  %v2010_v54 = vld [vmem:[%s3156_s23 + $0x10] sm:$0xff] }
 0xead   :  { %v1850_v58 = vpop.f32.mrf.mxu2 }
 0xeae   :  { %v2475_v57 = vpop.eup %2474  ;;  %vm1858_vm5 = vcmp.gt.f32.partialorder %v1850_v58, 0.0 }
 0xeaf   :  { %v1861_v30 = vsel %vm1858_vm5, %v1850_v58, 1.0  ;;  %1868 = vperm.xlu0 %2385, %v2475_v57   ;;  %v2008_v57 = vld [vmem:[%s3156_s23] sm:$0xff] }
 0xeb0   :  { %2476 = vrcp.f32 %v1861_v30  ;;  %v2393_v30 = vld [vmem:[%s3123_s9] ss:$0 sm:$0xff] }
 0xeb5   :  { %v1853_v60 = vpop.f32.mrf.mxu2 }
 0xeb6   :  { %v2477_v49 = vpop.eup %2476  ;;  %vm1859_vm8 = vcmp.gt.f32.partialorder %v1853_v60, 0.0 }
 0xeb7   :  { %v1862_v56 = vsel %vm1859_vm8, %v1853_v60, 1.0  ;;  %1873 = vperm.xlu2 %2386, %v2477_v49  }
 0xeb8   :  { %2478 = vrcp.f32 %v1862_v56 }
 0xebd   :  { %v1855_v17 = vpop.f32.mrf.mxu2 }
 0xebe   :  { %v2479_v3 = vpop.eup %2478 }
 0xebf   :  { %1878 = vperm.xlu1 %2352, %v2479_v3  }
 0xed9   :  { %1888 = vadd.xlane.f32.xlu0 %v1887_v29 }
 0xee0   :  { %1885 = vadd.xlane.f32.xlu2 %v1884_v9 }
 0xee1   :  { %1894 = vadd.xlane.f32.xlu0 %v1893_v21 }
 0xee8   :  { %1891 = vadd.xlane.f32.xlu2 %v1890_v16 }
 0xee9   :  { %1900 = vadd.xlane.f32.xlu0 %v1899_v14 }
 0xef0   :  { %1897 = vadd.xlane.f32.xlu2 %v1896_v19 }
 0xf11   :  { %v1874_v31 = vpop.permute.xlu2 %1873 }
 0xf12   :  { %v1882_v33 = vmul.f32 %v1874_v31, %v1850_v58  ;;  %v2009_v58 = vld [vmem:[%s3156_s23 + $0x8] sm:$0xff] }
 0xf21   :  { %v1869_v26 = vpop.permute.xlu0 %1868 }
 0xf22   :  { %v1881_v53 = vmul.f32 %v1869_v26, %v1848_v52 }
 0xf24   :  { %2267 = vmatmul.msk.f32.vlgmr.msrb.gmra.mxu0 %vm798_vm11, %v1881_v53 }
 0xf2c   :  { %2268 = vmatmul.msk.f32.gmra.mxu0 %vm798_vm11, %v1882_v33 }
 0xf31   :  { %v1879_v5 = vpop.permute.xlu1 %1878 }
 0xf32   :  { %v1883_v35 = vmul.f32 %v1879_v5, %v1853_v60 }
 0xf34   :  { %2269 = vmatmul.msk.f32.gmra.mxu0 %vm798_vm11, %v1883_v35 }
 0xf4c   :  { %v1889_v8 = vpop.xlane.xlu0 %1888 }
 0xf4d   :  { %v1903_v0 = vmul.f32 %v1889_v8, %v2918_v10 }
 0xf4f   :  { %2113 = vst.msk [vmem:[%s2152_s16 + $0x8] sm:$0xff] %vm2108_vm10, %v1903_v0 }
 0xf53   :  { %v1886_v40 = vpop.xlane.xlu2 %1885 }
 0xf54   :  { %v1902_v6 = vmul.f32 %v1886_v40, %v2918_v10  ;;  %v1895_v59 = vpop.xlane.xlu0 %1894 }
 0xf55   :  { %v1905_v27 = vmul.f32 %v1895_v59, %v2918_v10 }
 0xf56   :  { %2112 = vst.msk [vmem:[%s2152_s16] sm:$0xff] %vm2108_vm10, %v1902_v6 }
 0xf57   :  { %2115 = vst.msk [vmem:[%s2152_s16 + $0x18] sm:$0xff] %vm2108_vm10, %v1905_v27 }
 0xf5b   :  { %v1892_v39 = vpop.xlane.xlu2 %1891 }
 0xf5c   :  { %v1904_v22 = vmul.f32 %v1892_v39, %v2918_v10  ;;  %v1901_v47 = vpop.xlane.xlu0 %1900 }
 0xf5d   :  { %v1907_v18 = vmul.f32 %v1901_v47, %v2918_v10 }
 0xf5e   :  { %2114 = vst.msk [vmem:[%s2152_s16 + $0x10] sm:$0xff] %vm2108_vm10, %v1904_v22 }
 0xf5f   :  { %2117 = vst.msk [vmem:[%s2152_s16 + $0x28] sm:$0xff] %vm2108_vm10, %v1907_v18 }
 0xf63   :  { %v1898_v43 = vpop.xlane.xlu2 %1897 }
 0xf64   :  { %v1906_v63 = vmul.f32 %v1898_v43, %v2918_v10  ;;  %v2015_v10 = vld [vmem:[%s3156_s23 + $0x38] sm:$0xff] }
 0xf65   :  { %2033 = vmatpush.msra.mxu1 %v2015_v10  ;;  %2278 = vmatpush.msra.mxu2 %v2015_v10 }
 0xf66   :  { %2116 = vst.msk [vmem:[%s2152_s16 + $0x20] sm:$0xff] %vm2108_vm10, %v1906_v63 }
 0xf67   :  { %2034 = vmatpush.msra.mxu1 %v2014_v36  ;;  %2279 = vmatpush.msra.mxu2 %v2014_v36 }
 0xf69   :  { %2035 = vmatpush.msra.mxu1 %v2013_v46  ;;  %2280 = vmatpush.msra.mxu2 %v2013_v46 }
 0xf6b   :  { %2036 = vmatpush.msra.mxu1 %v2012_v48  ;;  %2281 = vmatpush.msra.mxu2 %v2012_v48 }
 0xf6d   :  { %2037 = vmatpush.msra.mxu1 %v2011_v2  ;;  %2282 = vmatpush.msra.mxu2 %v2011_v2 }
 0xf6f   :  { %2038 = vmatpush.msra.mxu1 %v2010_v54  ;;  %2283 = vmatpush.msra.mxu2 %v2010_v54 }
 0xf71   :  { %2039 = vmatpush.msra.mxu1 %v2009_v58  ;;  %2284 = vmatpush.msra.mxu2 %v2009_v58 }
 0xf73   :  { %2040 = vmatpush.msra.mxu1 %v2008_v57  ;;  %2285 = vmatpush.msra.mxu2 %v2008_v57 }
 0xfa1   :  { %v1946_v4 = vpop.f32.mrf.mxu0 }
 0xfa2   :  { %v1947_v23 = vadd.f32 %v2392_v44, %v1946_v4 }
 0xfa4   :  { %v1955_v11 = vmax.f32 %v1947_v23, 0.0 }
 0xfa6   :  { %2270 = vmatmul.msk.f32.vlgmr.msra.gmra.mxu3 %vm798_vm11, %v1955_v11 }
 0xfa9   :  { %v1949_v24 = vpop.f32.mrf.mxu0 }
 0xfaa   :  { %v1950_v20 = vadd.f32 %v2392_v44, %v1949_v24 }
 0xfac   :  { %v1956_v62 = vmax.f32 %v1950_v20, 0.0 }
 0xfae   :  { %2271 = vmatmul.msk.f32.gmra.mxu3 %vm798_vm11, %v1956_v62 }
 0xfb1   :  { %v1952_v50 = vpop.f32.mrf.mxu0 }
 0xfb2   :  { %v1953_v51 = vadd.f32 %v2392_v44, %v1952_v50 }
 0xfb4   :  { %v1957_v52 = vmax.f32 %v1953_v51, 0.0 }
 0xfb6   :  { %2272 = vmatmul.msk.f32.gmra.mxu3 %vm798_vm11, %v1957_v52 }
0x1029   :  { %v1996_v60 = vpop.f32.mrf.mxu3 }
0x102a   :  { %v1997_v49 = vadd.f32 %v2393_v30, %v1996_v60 }
0x102c   :  { %v2005_v56 = vmax.f32 %v1997_v49, 0.0 }
0x102e   :  { %2273 = vmatmul.msk.f32.vlgmr.msra.gmra.mxu1 %vm798_vm11, %v2005_v56 }
0x1031   :  { %v1999_v17 = vpop.f32.mrf.mxu3 }
0x1032   :  { %v2000_v3 = vadd.f32 %v2393_v30, %v1999_v17 }
0x1034   :  { %v2006_v29 = vmax.f32 %v2000_v3, 0.0 }
0x1036   :  { %2274 = vmatmul.msk.f32.gmra.mxu1 %vm798_vm11, %v2006_v29 }
0x1039   :  { %v2002_v9 = vpop.f32.mrf.mxu3 }
0x103a   :  { %v2003_v21 = vadd.f32 %v2393_v30, %v2002_v9 }
0x103c   :  { %v2007_v16 = vmax.f32 %v2003_v21, 0.0 }
0x103e   :  { %2275 = vmatmul.msk.f32.vlgmr.msra.gmra.mxu2 %vm798_vm11, %v2007_v16 }
0x10ab   :  { %v2042_v14 = vpop.f32.mrf.mxu1 }
0x10ac   :  { %v2051_v19 = vsub.f32 0.0, %v2042_v14 }
0x10ae   :  { %v2054_v61 = vmul.f32 1.442695, %v2051_v19 }
0x10b0   :  { %2480 = vpow2.f32 %v2054_v61 }
0x10b3   :  { %v2045_v34 = vpop.f32.mrf.mxu1 }
0x10b4   :  { %v2052_v13 = vsub.f32 0.0, %v2045_v34 }
0x10b6   :  { %v2481_v15 = vpop.eup %2480  ;;  %v2056_v32 = vmul.f32 1.442695, %v2052_v13 }
0x10b7   :  { %v2060_v37 = vadd.f32 1.0, %v2481_v15 }
0x10b8   :  { %2482 = vpow2.f32 %v2056_v32 }
0x10b9   :  { %2484 = vrcp.f32 %v2060_v37  ;;  %v2074_v35 = vand.u32 2147483648, %v2060_v37  ;;  %v2072_v45 = vand.u32 2147483647, %v2060_v37  ;;  %vm2068_vm11 = vweird.f32 %v2060_v37 }
0x10bb   :  { %v2075_v12 = vor.u32 1.1754944e-38, %v2074_v35  ;;  %vm2073_vm7 = vcmp.eq.f32.partialorder %v2072_v45, 8.507059e+37 }
0x10be   :  { %v2483_v7 = vpop.eup %2482 }
0x10bf   :  { %v2485_v25 = vpop.eup %2484  ;;  %v2061_v26 = vadd.f32 1.0, %v2483_v7 }
0x10c0   :  { %v2064_v53 = vmul.f32 %v2485_v25, %v2060_v37  ;;  %vm2069_vm15 = vweird.f32 %v2485_v25 }
0x10c1   :  { %2486 = vrcp.f32 %v2061_v26  ;;  %v2048_v31 = vpop.f32.mrf.mxu2  ;;  %vm2070_vm9 = vmor %vm2068_vm11, %vm2069_vm15  ;;  %v2089_v27 = vand.u32 2147483648, %v2061_v26  ;;  %v2087_v47 = vand.u32 2147483647, %v2061_v26  ;;  %vm2083_vm13 = vweird.f32 %v2061_v26 }
0x10c2   :  { %v2065_v33 = vsub.f32 1.0, %v2064_v53  ;;  %v2053_v5 = vsub.f32 0.0, %v2048_v31 }
0x10c3   :  { %v2090_v63 = vor.u32 1.1754944e-38, %v2089_v27  ;;  %vm2088_vm3 = vcmp.eq.f32.partialorder %v2087_v47, 8.507059e+37 }
0x10c4   :  { %v2066_v41 = vmul.f32 %v2485_v25, %v2065_v33  ;;  %v2058_v42 = vmul.f32 1.442695, %v2053_v5 }
0x10c6   :  { %v2067_v1 = vadd.f32 %v2485_v25, %v2066_v41  ;;  %2488 = vpow2.f32 %v2058_v42 }
0x10c7   :  { %v2487_v8 = vpop.eup %2486 }
0x10c8   :  { %v2071_v0 = vsel %vm2070_vm9, %v2485_v25, %v2067_v1  ;;  %v2079_v40 = vmul.f32 %v2487_v8, %v2061_v26  ;;  %vm2084_vm12 = vweird.f32 %v2487_v8 }
0x10c9   :  { %v2076_v6 = vsel %vm2073_vm7, %v2075_v12, %v2071_v0  ;;  %vm2085_vm2 = vmor %vm2083_vm13, %vm2084_vm12 }
0x10ca   :  { %2109 = vst.msk [vmem:[%s3177_s21] sm:$0xff] %vm2108_vm10, %v2076_v6  ;;  %v2080_v59 = vsub.f32 1.0, %v2079_v40 }
0x10cc   :  { %v2489_v39 = vpop.eup %2488  ;;  %v2081_v22 = vmul.f32 %v2487_v8, %v2080_v59 }
0x10cd   :  { %v2062_v18 = vadd.f32 1.0, %v2489_v39 }
0x10ce   :  { %v2082_v43 = vadd.f32 %v2487_v8, %v2081_v22 }
0x10cf   :  { %2490 = vrcp.f32 %v2062_v18  ;;  %v2104_v46 = vand.u32 2147483648, %v2062_v18  ;;  %v2102_v2 = vand.u32 2147483647, %v2062_v18  ;;  %vm2098_vm14 = vweird.f32 %v2062_v18 }
0x10d0   :  { %v2086_v55 = vsel %vm2085_vm2, %v2487_v8, %v2082_v43 }
0x10d1   :  { %v2091_v38 = vsel %vm2088_vm3, %v2090_v63, %v2086_v55  ;;  %v2105_v4 = vor.u32 1.1754944e-38, %v2104_v46  ;;  %vm2103_vm1 = vcmp.eq.f32.partialorder %v2102_v2, 8.507059e+37 }
0x10d2   :  { %2110 = vst.msk [vmem:[%s3177_s21 + $0x8] sm:$0xff] %vm2108_vm10, %v2091_v38 }
0x10d5   :  { %v2491_v28 = vpop.eup %2490 }
0x10d6   :  { %v2094_v10 = vmul.f32 %v2491_v28, %v2062_v18  ;;  %vm2099_vm6 = vweird.f32 %v2491_v28 }
0x10d7   :  { %vm2100_vm0 = vmor %vm2098_vm14, %vm2099_vm6 }
0x10d8   :  { %v2095_v36 = vsub.f32 1.0, %v2094_v10 }
0x10da   :  { %v2096_v48 = vmul.f32 %v2491_v28, %v2095_v36 }
0x10dc   :  { %v2097_v44 = vadd.f32 %v2491_v28, %v2096_v48 }
0x10de   :  { %v2101_v23 = vsel %vm2100_vm0, %v2491_v28, %v2097_v44 }
0x10df   :  { %v2106_v11 = vsel %vm2103_vm1, %v2105_v4, %v2101_v23 }
0x10e0   :  { %2111 = vst.msk [vmem:[%s3177_s21 + $0x10] sm:$0xff] %vm2108_vm10, %v2106_v11 }

</bundles_post_ra>
